<compile_context>
chip_gen: v7x
topology: tpu7x:2x2x1
jax: 0.10.0
libtpu: 0.0.40
codegen_flags: <defaults>
</compile_context>

<pallas_src>
from functools import partial

import jax
import jax.numpy as jnp
from jax.experimental import pallas as pl
from jax.experimental.pallas import tpu as pltpu


def _round_up(x, m):
    return ((x + m - 1) // m) * m


def _supcon_kernel(row_lab_ref, col_lab_ref, anchor_ref, contrast_ref, out_ref,
                   m_scr, l_scr, sp_scr, pc_scr, *, n_real, m_real, mask_cols):
    # row_lab_ref:  [TILE_M, 1] int32   anchor-row labels
    # col_lab_ref:  [1, TILE_N] int32   contrast-column labels
    # anchor_ref:   [TILE_M, D_pad]     pre-scaled by 1/sqrt(T) on the host
    # contrast_ref: [TILE_N, D_pad]     pre-scaled by 1/sqrt(T) on the host
    # out_ref:      [TILE_M, 1] f32     per-row mean log-prob of positives (0 if padded)
    # scratch:      m (running max), l (rescaled exp-sum), sp (sum pos logits), pc (pos count)
    i = pl.program_id(0)
    j = pl.program_id(1)
    nj = pl.num_programs(1)
    tm = anchor_ref.shape[0]
    tn = contrast_ref.shape[0]

    @pl.when(j == 0)
    def _():
        m_scr[...] = jnp.full_like(m_scr, -1e30)
        l_scr[...] = jnp.zeros_like(l_scr)
        sp_scr[...] = jnp.zeros_like(sp_scr)
        pc_scr[...] = jnp.zeros_like(pc_scr)

    # (a/sqrt(T)) @ (c/sqrt(T))^T == (a @ c^T)/T ; f32 MXU accumulation, no
    # in-kernel scaling pass and no materialized transpose (contract dim 1 of both).
    logits = jax.lax.dot_general(
        anchor_ref[...], contrast_ref[...],
        dimension_numbers=(((1,), (1,)), ((), ())),
        preferred_element_type=jnp.float32)                       # [TILE_M, TILE_N]

    col_g = j * tn + jax.lax.broadcasted_iota(jnp.int32, (tm, tn), 1)
    row_g = i * tm + jax.lax.broadcasted_iota(jnp.int32, (tm, tn), 0)
    not_diag = row_g != col_g
    if mask_cols:
        col_valid = col_g < n_real
        lmask = jnp.logical_and(not_diag, col_valid)              # logits_mask
        logits_for_max = jnp.where(col_valid, logits, -1e30)      # pad cols out of max
    else:
        lmask = not_diag
        logits_for_max = logits                                   # aligned case: no clamp

    # Online softmax denominator (self-contrast column included in the max like
    # torch; the shift cancels in the final value so this only affects stability).
    tile_max = jnp.max(logits_for_max, axis=1, keepdims=True)
    m_new = jnp.maximum(m_scr[...], tile_max)
    alpha = jnp.exp(m_scr[...] - m_new)
    exp_l = jnp.where(lmask, jnp.exp(logits - m_new), 0.0)
    l_scr[...] = alpha * l_scr[...] + jnp.sum(exp_l, axis=1, keepdims=True)
    m_scr[...] = m_new

    # Positive-pair accumulation on raw (scaled) logits; linear, so no rescaling.
    pos_mask = jnp.logical_and(row_lab_ref[...] == col_lab_ref[...], lmask)
    sp_scr[...] += jnp.sum(jnp.where(pos_mask, logits, 0.0), axis=1, keepdims=True)
    pc_scr[...] += jnp.sum(pos_mask.astype(jnp.float32), axis=1, keepdims=True)

    @pl.when(j == nj - 1)
    def _():
        pc = pc_scr[...]
        # mean_log_prob_pos = sum_pos(logits)/pc - m - log(l); max shift cancels.
        mlpp = sp_scr[...] / jnp.maximum(pc, 1.0) - m_scr[...] - jnp.log(l_scr[...])
        row_valid = (i * tm +
                     jax.lax.broadcasted_iota(jnp.int32, (tm, 1), 0)) < m_real
        # TODO(synk): real rows with zero positives give 0 here; torch would give NaN.
        out_ref[...] = jnp.where(jnp.logical_and(row_valid, pc > 0.0), mlpp, 0.0)


def supcon_loss(features, labels=None, mask=None, min_len=None, *,
                temperature=0.07, contrast_mode='all', base_temperature=0.07,
                tile_m=128, tile_n=512, mxu_dtype=jnp.bfloat16):
    """JAX/Pallas equivalent of SupConLoss.forward (contrast_mode='all')."""
    if features.ndim < 3:
        raise ValueError('`features` needs to be [bsz, n_views, ...], >=3 dims required')
    if tile_m % 128 != 0 or tile_n % tile_m != 0:
        raise ValueError('tile_m must be a multiple of 128 and tile_n a multiple of tile_m')
    bsz, n_views = features.shape[0], features.shape[1]
    feats = features.reshape(bsz, n_views, -1).astype(jnp.float32)
    d = feats.shape[-1]

    if labels is not None and mask is not None:
        raise ValueError('Cannot define both `labels` and `mask`')
    if mask is not None:
        # TODO(synk): explicit/asymmetric `mask` not supported; masks built from labels.
        raise NotImplementedError('explicit `mask` not supported by this kernel')
    if labels is None:
        labels = jnp.arange(bsz, dtype=jnp.int32)   # eye(bsz) == equality of arange
    else:
        labels = jnp.asarray(labels).reshape(-1).astype(jnp.int32)
        if labels.shape[0] != bsz:
            raise ValueError('Num of labels does not match num of features')
    if contrast_mode != 'all':
        # TODO(synk): contrast_mode='one' path not implemented (module default is 'all').
        raise ValueError('Only contrast_mode="all" is implemented')

    n_total = n_views * bsz
    # contrast_feature = cat(unbind(features, dim=1), dim=0) -> view-major [N, D]
    contrast = jnp.transpose(feats, (1, 0, 2)).reshape(n_total, d)
    n_real = n_total
    m_real = n_total if min_len is None else max(1, min(int(min_len), n_total))

    # Padding: lanes (D) to 128, N to a TILE_N multiple, M to a TILE_M multiple.
    d_pad = _round_up(d, 128)
    tile_n_eff = min(tile_n, _round_up(n_real, tile_m))     # multiple of tile_m & 128
    n_pad = _round_up(n_real, tile_n_eff)
    m_pad = _round_up(m_real, tile_m)                        # <= n_pad by construction
    num_m, num_n = m_pad // tile_m, n_pad // tile_n_eff

    # Fold the temperature in f32 on the host as 1/sqrt(T) into the single shared
    # feature array (anchor rows are a prefix of contrast -> pass it twice below).
    scale = float(1.0 / (temperature ** 0.5))
    contrast_p = jnp.pad(contrast * scale,
                         ((0, n_pad - n_real), (0, d_pad - d))).astype(mxu_dtype)

    tiled_labels = jnp.tile(labels, n_views)                           # [N]
    col_lab = jnp.pad(tiled_labels, (0, n_pad - n_real),
                      constant_values=-1).reshape(1, n_pad)
    row_lab = jnp.pad(tiled_labels[:m_real], (0, m_pad - m_real),
                      constant_values=-1).reshape(m_pad, 1)

    kernel = partial(_supcon_kernel, n_real=n_real, m_real=m_real,
                     mask_cols=(n_real != n_pad))

    # Explicit scoped-VMEM budget: double-buffered MXU operands + generous room for
    # the f32 [TILE_M, TILE_N] intermediates; capped for v7x's 64 MiB/TC.
    itemsize = jnp.dtype(mxu_dtype).itemsize
    est = (2 * (tile_n_eff + tile_m) * d_pad * itemsize
           + 12 * tile_m * tile_n_eff * 4
           + 32 * tile_m * 4 + 8 * tile_n_eff * 4)
    vmem_limit = int(min(max(est + (8 << 20), 32 << 20), 48 << 20))

    per_row = pl.pallas_call(
        kernel,
        out_shape=jax.ShapeDtypeStruct((m_pad, 1), jnp.float32),
        grid_spec=pltpu.PrefetchScalarGridSpec(
            num_scalar_prefetch=0,
            grid=(num_m, num_n),
            in_specs=[
                pl.BlockSpec((tile_m, 1), lambda i, j: (i, 0)),           # row labels
                pl.BlockSpec((1, tile_n_eff), lambda i, j: (0, j)),       # col labels
                pl.BlockSpec((tile_m, d_pad), lambda i, j: (i, 0)),       # anchor tile (prefix of contrast)
                pl.BlockSpec((tile_n_eff, d_pad), lambda i, j: (j, 0)),   # streamed contrast tile
            ],
            out_specs=pl.BlockSpec((tile_m, 1), lambda i, j: (i, 0)),
            scratch_shapes=[pltpu.VMEM((tile_m, 1), jnp.float32)] * 4,
        ),
        compiler_params=pltpu.CompilerParams(
            dimension_semantics=("parallel", "arbitrary"),
            vmem_limit_bytes=vmem_limit),
    )(row_lab, col_lab, contrast_p, contrast_p)

    # Final mean over the m_real anchor rows and -(T/base_T) scale: tiny, done in JAX.
    return -(temperature / base_temperature) * jnp.sum(per_row) / m_real


def _supcon_loss_ref(features, labels, min_len, *, temperature=0.07, base_temperature=0.07):
    """Pure-JAX dense reference mirroring the PyTorch module for validation."""
    bsz, n_views = features.shape[0], features.shape[1]
    feats = features.reshape(bsz, n_views, -1).astype(jnp.float32)
    labels = jnp.asarray(labels).reshape(-1, 1)
    base_mask = (labels == labels.T).astype(jnp.float32)
    n_total = n_views * bsz
    contrast = jnp.transpose(feats, (1, 0, 2)).reshape(n_total, -1)
    anchor = contrast[:min_len]
    adc = anchor @ contrast.T / temperature
    logits = adc - jnp.max(adc, axis=1, keepdims=True)
    full_mask = jnp.tile(base_mask, (n_views, n_views))
    lmask = jnp.ones((n_total, n_total)) - jnp.eye(n_total)
    full_mask = (full_mask * lmask)[:min_len]
    lmask = lmask[:min_len]
    exp_logits = jnp.exp(logits) * lmask
    log_prob = logits - jnp.log(exp_logits.sum(1, keepdims=True))
    mean_log_prob_pos = (full_mask * log_prob).sum(1) / full_mask.sum(1)
    return jnp.mean(-(temperature / base_temperature) * mean_log_prob_pos)


def _normalize(feats):
    flat = feats.reshape(feats.shape[0], feats.shape[1], -1)
    return flat / jnp.linalg.norm(flat, axis=-1, keepdims=True)


if __name__ == "__main__":
    key = jax.random.PRNGKey(0)
    k1, k2 = jax.random.split(key)

    # --- Case 1: small, >3-dim features, min_len slicing, single tile --------
    bsz, n_views = 8, 2
    raw = jax.random.normal(k1, (bsz, n_views, 4, 8), dtype=jnp.float32)
    # SupCon is used with L2-normalized features; unnormalized features at T=0.07
    # underflow the masked exp-sum in both torch and jax, so normalize here.
    features1 = _normalize(raw).reshape(bsz, n_views, 4, 8)
    labels1 = jnp.array([0, 1, 2, 3, 0, 1, 2, 3], dtype=jnp.int32)
    min_len1 = 12

    ref1 = _supcon_loss_ref(features1, labels1, min_len1)
    loss1_f32 = jax.block_until_ready(
        supcon_loss(features1, labels=labels1, min_len=min_len1, mxu_dtype=jnp.float32))
    loss1_bf16 = jax.block_until_ready(
        supcon_loss(features1, labels=labels1, min_len=min_len1))          # bf16 default
    assert bool(jnp.isfinite(loss1_f32)) and bool(jnp.isfinite(loss1_bf16))
    assert jnp.allclose(loss1_f32, ref1, atol=5e-4, rtol=5e-4), (loss1_f32, ref1)
    assert jnp.allclose(loss1_bf16, ref1, atol=8e-2, rtol=3e-2), (loss1_bf16, ref1)

    # --- Case 2: multi M-tile and multi N-tile online-softmax path -----------
    bsz2, n_views2, d2 = 96, 2, 64
    raw2 = jax.random.normal(k2, (bsz2, n_views2, d2), dtype=jnp.float32)
    features2 = _normalize(raw2)
    labels2 = (jnp.arange(bsz2) % 12).astype(jnp.int32)
    n_total2 = bsz2 * n_views2                                  # 192 -> 2 M-tiles
    min_len2 = n_total2

    ref2 = _supcon_loss_ref(features2, labels2, min_len2)
    loss2_f32 = jax.block_until_ready(
        supcon_loss(features2, labels=labels2, min_len=min_len2,
                    tile_m=128, tile_n=128, mxu_dtype=jnp.float32))        # 2 N-tiles
    loss2_bf16 = jax.block_until_ready(
        supcon_loss(features2, labels=labels2, min_len=min_len2,
                    tile_m=128, tile_n=128))
    assert bool(jnp.isfinite(loss2_f32)) and bool(jnp.isfinite(loss2_bf16))
    assert jnp.allclose(loss2_f32, ref2, atol=1e-3, rtol=1e-3), (loss2_f32, ref2)
    assert jnp.allclose(loss2_bf16, ref2, atol=1e-1, rtol=3e-2), (loss2_bf16, ref2)

    print("KERNEL_OK")
</pallas_src>

<mosaic_0001>
module attributes {stable_mosaic.version = 11 : i64} {
  func.func @_supcon_kernel(%arg0: i32, %arg1: i32, %arg2: memref<128x1xi32, #tpu.memory_space<vmem>>, %arg3: memref<1x128xi32, #tpu.memory_space<vmem>>, %arg4: memref<128x128xf32, #tpu.memory_space<vmem>>, %arg5: memref<128x128xf32, #tpu.memory_space<vmem>>, %arg6: memref<128x1xf32, #tpu.memory_space<vmem>>, %arg7: memref<128x1xf32, #tpu.memory_space<vmem>>, %arg8: memref<128x1xf32, #tpu.memory_space<vmem>>, %arg9: memref<128x1xf32, #tpu.memory_space<vmem>>, %arg10: memref<128x1xf32, #tpu.memory_space<vmem>>) attributes {dimension_semantics = [#tpu.dimension_semantics<parallel>, #tpu.dimension_semantics<arbitrary>], iteration_bounds = array<i64: 1, 1>, scalar_prefetch = 0 : i64, scratch_operands = 4 : i64, tpu.core_type = #tpu.core_type<tc>, window_params = [{transform_indices = @transform_0, window_bounds = array<i64: 128, 1>}, {transform_indices = @transform_1, window_bounds = array<i64: 1, 128>}, {transform_indices = @transform_2, window_bounds = array<i64: 128, 128>}, {transform_indices = @transform_3, window_bounds = array<i64: 128, 128>}, {transform_indices = @transform_4, window_bounds = array<i64: 128, 1>}]} {
    %c0_i32 = arith.constant 0 : i32
    %0 = arith.cmpi eq, %arg1, %c0_i32 : i32
    %1 = arith.extui %0 : i1 to i32
    %c0_i32_0 = arith.constant 0 : i32
    %2 = arith.cmpi ne, %1, %c0_i32_0 : i32
    scf.if %2 {
      %cst_36 = arith.constant -1.000000e+30 : f32
      %62 = vector.broadcast %cst_36 : f32 to vector<128x1xf32>
      %c0_37 = arith.constant 0 : index
      %c0_38 = arith.constant 0 : index
      %63 = vector.load %arg7[%c0_37, %c0_38] : memref<128x1xf32, #tpu.memory_space<vmem>>, vector<128x1xf32>
      tpu.vector_store %arg7[%c0_37, %c0_38], %62 {strides = array<i32>} : memref<128x1xf32, #tpu.memory_space<vmem>>, vector<128x1xf32>,
      %cst_39 = arith.constant 0.000000e+00 : f32
      %64 = vector.broadcast %cst_39 : f32 to vector<128x1xf32>
      %c0_40 = arith.constant 0 : index
      %c0_41 = arith.constant 0 : index
      %65 = vector.load %arg8[%c0_40, %c0_41] : memref<128x1xf32, #tpu.memory_space<vmem>>, vector<128x1xf32>
      tpu.vector_store %arg8[%c0_40, %c0_41], %64 {strides = array<i32>} : memref<128x1xf32, #tpu.memory_space<vmem>>, vector<128x1xf32>,
      %cst_42 = arith.constant 0.000000e+00 : f32
      %66 = vector.broadcast %cst_42 : f32 to vector<128x1xf32>
      %c0_43 = arith.constant 0 : index
      %c0_44 = arith.constant 0 : index
      %67 = vector.load %arg9[%c0_43, %c0_44] : memref<128x1xf32, #tpu.memory_space<vmem>>, vector<128x1xf32>
      tpu.vector_store %arg9[%c0_43, %c0_44], %66 {strides = array<i32>} : memref<128x1xf32, #tpu.memory_space<vmem>>, vector<128x1xf32>,
      %cst_45 = arith.constant 0.000000e+00 : f32
      %68 = vector.broadcast %cst_45 : f32 to vector<128x1xf32>
      %c0_46 = arith.constant 0 : index
      %c0_47 = arith.constant 0 : index
      %69 = vector.load %arg10[%c0_46, %c0_47] : memref<128x1xf32, #tpu.memory_space<vmem>>, vector<128x1xf32>
      tpu.vector_store %arg10[%c0_46, %c0_47], %68 {strides = array<i32>} : memref<128x1xf32, #tpu.memory_space<vmem>>, vector<128x1xf32>,
    } else {
    }
    %c0 = arith.constant 0 : index
    %c0_1 = arith.constant 0 : index
    %3 = vector.load %arg4[%c0, %c0_1] : memref<128x128xf32, #tpu.memory_space<vmem>>, vector<128x128xf32>
    %c0_2 = arith.constant 0 : index
    %c0_3 = arith.constant 0 : index
    %4 = vector.load %arg5[%c0_2, %c0_3] : memref<128x128xf32, #tpu.memory_space<vmem>>, vector<128x128xf32>
    %cst = arith.constant dense<0.000000e+00> : vector<128x128xf32>
    %5 = tpu.matmul %3, %4, %cst {dimension_numbers = #tpu.dot_dimension_numbers<[1], [1], [0], [0], [0, 0, 1, 0], [], []>} : vector<128x128xf32>, vector<128x128xf32>, vector<128x128xf32> -> vector<128x128xf32>
    %c128_i32 = arith.constant 128 : i32
    %6 = arith.muli %arg1, %c128_i32 : i32
    %7 = tpu.iota {dimensions = array<i32: 1>} : vector<128x128xi32>
    %8 = vector.broadcast %6 : i32 to vector<128x128xi32>
    %9 = arith.addi %8, %7 : vector<128x128xi32>
    %c128_i32_4 = arith.constant 128 : i32
    %10 = arith.muli %arg0, %c128_i32_4 : i32
    %11 = tpu.iota {dimensions = array<i32: 0>} : vector<128x128xi32>
    %12 = vector.broadcast %10 : i32 to vector<128x128xi32>
    %13 = arith.addi %12, %11 : vector<128x128xi32>
    %14 = arith.cmpi ne, %13, %9 : vector<128x128xi32>
    %c16_i32 = arith.constant 16 : i32
    %15 = vector.broadcast %c16_i32 : i32 to vector<128x128xi32>
    %16 = arith.cmpi slt, %9, %15 : vector<128x128xi32>
    %17 = arith.andi %14, %16 : vector<128x128xi1>
    %cst_5 = arith.constant -1.000000e+30 : f32
    %18 = vector.broadcast %cst_5 : f32 to vector<128x128xf32>
    %19 = arith.select %16, %5, %18 : vector<128x128xi1>, vector<128x128xf32>
    %cst_6 = arith.constant dense<0xFF800000> : vector<128xf32>
    %20 = vector.multi_reduction <maximumf>, %19, %cst_6 [1] : vector<128x128xf32> to vector<128xf32>
    %21 = vector.shape_cast %20 : vector<128xf32> to vector<128x1xf32>
    %c0_7 = arith.constant 0 : index
    %c0_8 = arith.constant 0 : index
    %22 = vector.load %arg7[%c0_7, %c0_8] : memref<128x1xf32, #tpu.memory_space<vmem>>, vector<128x1xf32>
    %23 = arith.maximumf %22, %21 : vector<128x1xf32>
    %c0_9 = arith.constant 0 : index
    %c0_10 = arith.constant 0 : index
    %24 = vector.load %arg7[%c0_9, %c0_10] : memref<128x1xf32, #tpu.memory_space<vmem>>, vector<128x1xf32>
    %25 = arith.subf %24, %23 : vector<128x1xf32>
    %26 = math.exp %25 : vector<128x1xf32>
    %27 = vector.broadcast %23 : vector<128x1xf32> to vector<128x128xf32>
    %28 = arith.subf %5, %27 : vector<128x128xf32>
    %29 = math.exp %28 : vector<128x128xf32>
    %cst_11 = arith.constant 0.000000e+00 : f32
    %30 = vector.broadcast %cst_11 : f32 to vector<128x128xf32>
    %31 = arith.select %17, %29, %30 : vector<128x128xi1>, vector<128x128xf32>
    %c0_12 = arith.constant 0 : index
    %c0_13 = arith.constant 0 : index
    %32 = vector.load %arg8[%c0_12, %c0_13] : memref<128x1xf32, #tpu.memory_space<vmem>>, vector<128x1xf32>
    %33 = arith.mulf %26, %32 : vector<128x1xf32>
    %cst_14 = arith.constant dense<0.000000e+00> : vector<128xf32>
    %34 = vector.multi_reduction <add>, %31, %cst_14 [1] : vector<128x128xf32> to vector<128xf32>
    %35 = vector.shape_cast %34 : vector<128xf32> to vector<128x1xf32>
    %36 = arith.addf %33, %35 : vector<128x1xf32>
    %c0_15 = arith.constant 0 : index
    %c0_16 = arith.constant 0 : index
    %37 = vector.load %arg8[%c0_15, %c0_16] : memref<128x1xf32, #tpu.memory_space<vmem>>, vector<128x1xf32>
    tpu.vector_store %arg8[%c0_15, %c0_16], %36 {strides = array<i32>} : memref<128x1xf32, #tpu.memory_space<vmem>>, vector<128x1xf32>,
    %c0_17 = arith.constant 0 : index
    %c0_18 = arith.constant 0 : index
    %38 = vector.load %arg7[%c0_17, %c0_18] : memref<128x1xf32, #tpu.memory_space<vmem>>, vector<128x1xf32>
    tpu.vector_store %arg7[%c0_17, %c0_18], %23 {strides = array<i32>} : memref<128x1xf32, #tpu.memory_space<vmem>>, vector<128x1xf32>,
    %c0_19 = arith.constant 0 : index
    %c0_20 = arith.constant 0 : index
    %39 = vector.load %arg2[%c0_19, %c0_20] : memref<128x1xi32, #tpu.memory_space<vmem>>, vector<128x1xi32>
    %c0_21 = arith.constant 0 : index
    %c0_22 = arith.constant 0 : index
    %40 = vector.load %arg3[%c0_21, %c0_22] : memref<1x128xi32, #tpu.memory_space<vmem>>, vector<1x128xi32>
    %41 = vector.broadcast %39 : vector<128x1xi32> to vector<128x128xi32>
    %42 = vector.broadcast %40 : vector<1x128xi32> to vector<128x128xi32>
    %43 = arith.cmpi eq, %41, %42 : vector<128x128xi32>
    %44 = arith.andi %43, %17 : vector<128x128xi1>
    %c0_23 = arith.constant 0 : index
    %c0_24 = arith.constant 0 : index
    %45 = vector.load %arg9[%c0_23, %c0_24] : memref<128x1xf32, #tpu.memory_space<vmem>>, vector<128x1xf32>
    %cst_25 = arith.constant 0.000000e+00 : f32
    %46 = vector.broadcast %cst_25 : f32 to vector<128x128xf32>
    %47 = arith.select %44, %5, %46 : vector<128x128xi1>, vector<128x128xf32>
    %cst_26 = arith.constant dense<0.000000e+00> : vector<128xf32>
    %48 = vector.multi_reduction <add>, %47, %cst_26 [1] : vector<128x128xf32> to vector<128xf32>
    %49 = vector.shape_cast %48 : vector<128xf32> to vector<128x1xf32>
    %50 = arith.addf %45, %49 : vector<128x1xf32>
    %c0_27 = arith.constant 0 : index
    %c0_28 = arith.constant 0 : index
    %51 = vector.load %arg9[%c0_27, %c0_28] : memref<128x1xf32, #tpu.memory_space<vmem>>, vector<128x1xf32>
    tpu.vector_store %arg9[%c0_27, %c0_28], %50 {strides = array<i32>} : memref<128x1xf32, #tpu.memory_space<vmem>>, vector<128x1xf32>,
    %c0_29 = arith.constant 0 : index
    %c0_30 = arith.constant 0 : index
    %52 = vector.load %arg10[%c0_29, %c0_30] : memref<128x1xf32, #tpu.memory_space<vmem>>, vector<128x1xf32>
    %53 = arith.extui %44 : vector<128x128xi1> to vector<128x128xi32>
    %54 = arith.sitofp %53 : vector<128x128xi32> to vector<128x128xf32>
    %cst_31 = arith.constant dense<0.000000e+00> : vector<128xf32>
    %55 = vector.multi_reduction <add>, %54, %cst_31 [1] : vector<128x128xf32> to vector<128xf32>
    %56 = vector.shape_cast %55 : vector<128xf32> to vector<128x1xf32>
    %57 = arith.addf %52, %56 : vector<128x1xf32>
    %c0_32 = arith.constant 0 : index
    %c0_33 = arith.constant 0 : index
    %58 = vector.load %arg10[%c0_32, %c0_33] : memref<128x1xf32, #tpu.memory_space<vmem>>, vector<128x1xf32>
    tpu.vector_store %arg10[%c0_32, %c0_33], %57 {strides = array<i32>} : memref<128x1xf32, #tpu.memory_space<vmem>>, vector<128x1xf32>,
    %c0_i32_34 = arith.constant 0 : i32
    %59 = arith.cmpi eq, %arg1, %c0_i32_34 : i32
    %60 = arith.extui %59 : i1 to i32
    %c0_i32_35 = arith.constant 0 : i32
    %61 = arith.cmpi ne, %60, %c0_i32_35 : i32
    scf.if %61 {
      %c0_36 = arith.constant 0 : index
      %c0_37 = arith.constant 0 : index
      %62 = vector.load %arg10[%c0_36, %c0_37] : memref<128x1xf32, #tpu.memory_space<vmem>>, vector<128x1xf32>
      %c0_38 = arith.constant 0 : index
      %c0_39 = arith.constant 0 : index
      %63 = vector.load %arg9[%c0_38, %c0_39] : memref<128x1xf32, #tpu.memory_space<vmem>>, vector<128x1xf32>
      %cst_40 = arith.constant 1.000000e+00 : f32
      %64 = vector.broadcast %cst_40 : f32 to vector<128x1xf32>
      %65 = arith.maximumf %62, %64 : vector<128x1xf32>
      %66 = arith.divf %63, %65 : vector<128x1xf32>
      %c0_41 = arith.constant 0 : index
      %c0_42 = arith.constant 0 : index
      %67 = vector.load %arg7[%c0_41, %c0_42] : memref<128x1xf32, #tpu.memory_space<vmem>>, vector<128x1xf32>
      %68 = arith.subf %66, %67 : vector<128x1xf32>
      %c0_43 = arith.constant 0 : index
      %c0_44 = arith.constant 0 : index
      %69 = vector.load %arg8[%c0_43, %c0_44] : memref<128x1xf32, #tpu.memory_space<vmem>>, vector<128x1xf32>
      %70 = math.log %69 : vector<128x1xf32>
      %71 = arith.subf %68, %70 : vector<128x1xf32>
      %c128_i32_45 = arith.constant 128 : i32
      %72 = arith.muli %arg0, %c128_i32_45 : i32
      %73 = tpu.iota {dimensions = array<i32: 0>} : vector<128x1xi32>
      %74 = vector.broadcast %72 : i32 to vector<128x1xi32>
      %75 = arith.addi %74, %73 : vector<128x1xi32>
      %c12_i32 = arith.constant 12 : i32
      %76 = vector.broadcast %c12_i32 : i32 to vector<128x1xi32>
      %77 = arith.cmpi slt, %75, %76 : vector<128x1xi32>
      %cst_46 = arith.constant 0.000000e+00 : f32
      %78 = vector.broadcast %cst_46 : f32 to vector<128x1xf32>
      %79 = arith.cmpf ogt, %62, %78 : vector<128x1xf32>
      %80 = arith.andi %77, %79 : vector<128x1xi1>
      %cst_47 = arith.constant 0.000000e+00 : f32
      %81 = vector.broadcast %cst_47 : f32 to vector<128x1xf32>
      %82 = arith.select %80, %71, %81 : vector<128x1xi1>, vector<128x1xf32>
      %c0_48 = arith.constant 0 : index
      %c0_49 = arith.constant 0 : index
      %83 = vector.load %arg6[%c0_48, %c0_49] : memref<128x1xf32, #tpu.memory_space<vmem>>, vector<128x1xf32>
      tpu.vector_store %arg6[%c0_48, %c0_49], %82 {strides = array<i32>} : memref<128x1xf32, #tpu.memory_space<vmem>>, vector<128x1xf32>,
    } else {
    }
    return
  }
  func.func @transform_0(%arg0: i32, %arg1: i32) -> (i32, i32) {
    %c0_i32 = arith.constant 0 : i32
    %c0_i32_0 = arith.constant 0 : i32
    return %arg0, %c0_i32 : i32, i32
  }
  func.func @transform_1(%arg0: i32, %arg1: i32) -> (i32, i32) {
    %c0_i32 = arith.constant 0 : i32
    %c0_i32_0 = arith.constant 0 : i32
    return %c0_i32, %arg1 : i32, i32
  }
  func.func @transform_2(%arg0: i32, %arg1: i32) -> (i32, i32) {
    %c0_i32 = arith.constant 0 : i32
    %c0_i32_0 = arith.constant 0 : i32
    return %arg0, %c0_i32 : i32, i32
  }
  func.func @transform_3(%arg0: i32, %arg1: i32) -> (i32, i32) {
    %c0_i32 = arith.constant 0 : i32
    %c0_i32_0 = arith.constant 0 : i32
    return %arg1, %c0_i32 : i32, i32
  }
  func.func @transform_4(%arg0: i32, %arg1: i32) -> (i32, i32) {
    %c0_i32 = arith.constant 0 : i32
    %c0_i32_0 = arith.constant 0 : i32
    return %arg0, %c0_i32 : i32, i32
  }
}

</mosaic_0001>

<bundles_post_ra>
// kernel: tpu_custom_call.1
= control target key start
LH: loop header
LB: loop body
LE: loop exit
PB: predicated region body
PF: predicated region fallthrough
CT: control target
= control target key end

     0   :  { %9 = vsyncpa [#allocation7], 0  ;;  %s1565_s15 = smov [#allocation6]   ;;  %s2707_s0 = inlined_call_operand.vmem [shape: s32[128,1], index: 0, kind: input, shape index: {}]   ;;  %s2708_s1 = inlined_call_operand.vmem [shape: s32[1,128], index: 1, kind: input, shape index: {}]   ;;  %s2709_s2 = inlined_call_operand.vmem [shape: f32[128,128], index: 2, kind: input, shape index: {}]   ;;  %s2710_s3 = inlined_call_operand.hbm [shape: f32[128,128], index: 3, kind: input, shape index: {}]   ;;  %s2711_s4 = inlined_call_operand.vmem [shape: f32[128,1], index: 4, kind: output, shape index: {}]  }
   0x1   :  { %s21_s16 = sshll.u32 %s1565_s15, 4  ;;  %s1541_s19 = scalar_lea.hbm %s2710_s3, 2048  ;;  %s22_s16 = int_to_ptr.vmem [resolvable:$true] %s21_s16 }
   0x2   :  { %p1542_p0 = scmp.ne.s32.totalorder %s2710_s3, %s1541_s19  ;;  %p1545_p1 = scmp.lt.u32.totalorder %s1541_s19, %s2710_s3 }
   0x4   :  { %p1547_p2 = pnand %p1545_p1, %p1542_p0 }
   0x6   :  { %1550 = shalt.err (!%p1547_p2)
}
   0x7   :  { %s1551_s24 = scalar_lea.vmem %s22_s16, 2048  ;;  %p1556_p4 = scmp.lt.s32.totalorder %s22_s16, %s22_s16 }
   0x8   :  { %p1552_p3 = scmp.ne.s32.totalorder %s22_s16, %s1551_s24  ;;  %p1557_p5 = scmp.lt.s32.totalorder %s1551_s24, %s1551_s24 }
   0xa   :  { %p1558_p6 = por %p1557_p5, %p1556_p4 }
   0xc   :  { %p1559_p7 = pnand %p1558_p6, %p1552_p3 }
   0xe   :  { %1562 = shalt.err (!%p1559_p7)
}
   0xf   :  { %s1566_s25 = smov 128   ;;  %s1567_s26 = smov 8  }
  0x10   :  { %27 = dma.hbm_to_vmem [thread:$0]  %s2710_s3, 2048, %s22_s16, [#allocation7], %s1566_s25, %s1566_s25, %s1567_s26  }
  0x11   :  { %1563 = dma.done.wait [#allocation7], 2048  }
  0x12   :  { %1564 = vsyncadd [#allocation7], 4294965248  ;;  %vm2712_vm0 = vcmask 7168   ;;  %v2727_v0 = vmov 0.0   ;;  %v1569_v1 = vmov 0   ;;  %v116_v2 = vld [vmem:[#allocation6] sm:$0xff]  ;;  %v278_v58 = vlaneseq }
  0x13   :  { %1289 = vst.msk [vmem:[%s2711_s4 + $0x10] sm:$0xff] %vm2712_vm0, %v2727_v0  ;;  %1290 = vst.msk [vmem:[%s2711_s4 + $0x18] sm:$0xff] %vm2712_vm0, %v2727_v0  ;;  %1468 = vset.pattern.permute.xlu0 %v1569_v1  ;;  %1467 = vset.pattern.permute.xlu1 %v1569_v1  ;;  %v117_v3 = vld [vmem:[#allocation6 + $0x8] sm:$0xff]  ;;  %v118_v4 = vld [vmem:[#allocation6 + $0x10] sm:$0xff]  ;;  %v2756_v63 = vmov 0 }
  0x14   :  { %1291 = vst.msk [vmem:[%s2711_s4 + $0x20] sm:$0xff] %vm2712_vm0, %v2727_v0  ;;  %1292 = vst.msk [vmem:[%s2711_s4 + $0x28] sm:$0xff] %vm2712_vm0, %v2727_v0  ;;  %v1413_v5 = vpack.c.bf16 %v117_v3, %v116_v2  ;;  %v119_v6 = vld [vmem:[#allocation6 + $0x18] sm:$0xff]  ;;  %v100_v8 = vld [vmem:[%s2709_s2] sm:$0xff]  ;;  %v1870_v59 = vshrl.u32 %v278_v58, 7  ;;  %v1872_v60 = vand.u32 127, %v278_v58 }
  0x15   :  { %1293 = vst.msk [vmem:[%s2711_s4 + $0x30] sm:$0xff] %vm2712_vm0, %v2727_v0  ;;  %1294 = vst.msk [vmem:[%s2711_s4 + $0x38] sm:$0xff] %vm2712_vm0, %v2727_v0  ;;  %v1417_v7 = vpack.c.bf16 %v119_v6, %v118_v4  ;;  %v108_v9 = vld [vmem:[%s2709_s2 + $0x40] sm:$0xff]  ;;  %v121_v11 = vld [vmem:[#allocation6 + $0x28] sm:$0xff]  ;;  %1389 = vmatprep.mubr.f32.mxu0 %v100_v8  ;;  %v2790_v8 = vmov 0 }
  0x16   :  { %1295 = vst.msk [vmem:[%s2711_s4 + $0x40] sm:$0xff] %vm2712_vm0, %v2727_v0  ;;  %1296 = vst.msk [vmem:[%s2711_s4 + $0x48] sm:$0xff] %vm2712_vm0, %v2727_v0  ;;  %1414 = vmatprep.subr.bf16.mxu0 %v1413_v5  ;;  %1445 = vmatprep.subr.bf16.mxu1 %v1413_v5  ;;  %v120_v10 = vld [vmem:[#allocation6 + $0x20] sm:$0xff]  ;;  %v736_v13 = vld [vmem:[%s2707_s0 + $0x8] sm:$0xff]  ;;  %v1875_v61 = vadd.s32 8, %v1870_v59  ;;  %vm2726_vm2 = vcmp.lt.s32.totalorder %v1872_v60, 16  ;;  %vm317_vm6 = vcmp.ne.s32.totalorder %v1870_v59, %v1872_v60 }
  0x17   :  { %1297 = vst.msk [vmem:[%s2711_s4 + $0x50] sm:$0xff] %vm2712_vm0, %v2727_v0  ;;  %1298 = vst.msk [vmem:[%s2711_s4 + $0x58] sm:$0xff] %vm2712_vm0, %v2727_v0  ;;  %1416 = vmatpush3.bf16.xpose.msra.mxu0 %v1413_v5  ;;  %1453 = vmatpush3.bf16.xpose.msra.mxu1 %v1413_v5  ;;  %v1421_v12 = vpack.c.bf16 %v121_v11, %v120_v10  ;;  %v737_v14 = vld [vmem:[%s2707_s0 + $0x10] sm:$0xff]  ;;  %v123_v16 = vld [vmem:[#allocation6 + $0x38] sm:$0xff]  ;;  %v2760_v5 = vmov 0 }
  0x18   :  { %1299 = vst.msk [vmem:[%s2711_s4 + $0x60] sm:$0xff] %vm2712_vm0, %v2727_v0  ;;  %1300 = vst.msk [vmem:[%s2711_s4 + $0x68] sm:$0xff] %vm2712_vm0, %v2727_v0  ;;  %1418 = vmatprep.subr.bf16.mxu0 %v1417_v7  ;;  %1446 = vmatprep.subr.bf16.mxu1 %v1417_v7  ;;  %v122_v15 = vld [vmem:[#allocation6 + $0x30] sm:$0xff]  ;;  %v738_v17 = vld [vmem:[%s2707_s0 + $0x18] sm:$0xff]  ;;  %vm318_vm1 = vcmp.ne.s32.totalorder %v1875_v61, %v1872_v60 }
  0x19   :  { %1301 = vst.msk [vmem:[%s2711_s4 + $0x70] sm:$0xff] %vm2712_vm0, %v2727_v0  ;;  %1302 = vst.msk [vmem:[%s2711_s4 + $0x78] sm:$0xff] %vm2712_vm0, %v2727_v0  ;;  %1401 = vmatprep.mubr.f32.mxu1 %v108_v9  ;;  %756 = vperm.xlu0 %1468, %v736_v13   ;;  %v735_v18 = vld [vmem:[%s2707_s0] sm:$0xff]  ;;  %v1425_v19 = vpack.c.bf16 %v123_v16, %v122_v15  ;;  %v745_v21 = vld [vmem:[%s2707_s0 + $0x50] sm:$0xff] }
  0x1a   :  { %52 = vst.msk [vmem:[#allocation3] sm:$0xff] %vm2712_vm0, %v2727_v0  ;;  %53 = vst.msk [vmem:[#allocation3 + $0x8] sm:$0xff] %vm2712_vm0, %v2727_v0  ;;  %753 = vperm.xlu1 %1467, %v735_v18   ;;  %v739_v20 = vld [vmem:[%s2707_s0 + $0x20] sm:$0xff]  ;;  %v125_v23 = vld [vmem:[#allocation6 + $0x48] sm:$0xff] }
  0x1b   :  { %54 = vst.msk [vmem:[#allocation3 + $0x10] sm:$0xff] %vm2712_vm0, %v2727_v0  ;;  %55 = vst.msk [vmem:[#allocation3 + $0x18] sm:$0xff] %vm2712_vm0, %v2727_v0  ;;  %v124_v22 = vld [vmem:[#allocation6 + $0x40] sm:$0xff]  ;;  %v740_v24 = vld [vmem:[%s2707_s0 + $0x28] sm:$0xff] }
  0x1c   :  { %56 = vst.msk [vmem:[#allocation3 + $0x20] sm:$0xff] %vm2712_vm0, %v2727_v0  ;;  %57 = vst.msk [vmem:[#allocation3 + $0x28] sm:$0xff] %vm2712_vm0, %v2727_v0  ;;  %v750_v25 = vld [vmem:[%s2707_s0 + $0x78] sm:$0xff]  ;;  %v1429_v26 = vpack.c.bf16 %v125_v23, %v124_v22  ;;  %v741_v27 = vld [vmem:[%s2707_s0 + $0x30] sm:$0xff]  ;;  %v293_v22 = vadd.s32 72, %v1870_v59  ;;  %v296_v23 = vadd.s32 96, %v1870_v59 }
  0x1d   :  { %58 = vst.msk [vmem:[#allocation3 + $0x30] sm:$0xff] %vm2712_vm0, %v2727_v0  ;;  %59 = vst.msk [vmem:[#allocation3 + $0x38] sm:$0xff] %vm2712_vm0, %v2727_v0  ;;  %759 = vperm.xlu0 %1468, %v737_v14   ;;  %v126_v28 = vld [vmem:[#allocation6 + $0x50] sm:$0xff]  ;;  %v127_v29 = vld [vmem:[#allocation6 + $0x58] sm:$0xff] }
  0x1e   :  { %60 = vst.msk [vmem:[#allocation3 + $0x40] sm:$0xff] %vm2712_vm0, %v2727_v0  ;;  %61 = vst.msk [vmem:[#allocation3 + $0x48] sm:$0xff] %vm2712_vm0, %v2727_v0  ;;  %783 = vperm.xlu1 %1467, %v745_v21   ;;  %v742_v30 = vld [vmem:[%s2707_s0 + $0x38] sm:$0xff]  ;;  %v1433_v31 = vpack.c.bf16 %v127_v29, %v126_v28  ;;  %v743_v32 = vld [vmem:[%s2707_s0 + $0x40] sm:$0xff] }
  0x1f   :  { %62 = vst.msk [vmem:[#allocation3 + $0x50] sm:$0xff] %vm2712_vm0, %v2727_v0  ;;  %63 = vst.msk [vmem:[#allocation3 + $0x58] sm:$0xff] %vm2712_vm0, %v2727_v0  ;;  %1420 = vmatpush3.bf16.xpose.msra.mxu0 %v1417_v7  ;;  %1454 = vmatpush3.bf16.xpose.msra.mxu1 %v1417_v7  ;;  %v128_v33 = vld [vmem:[#allocation6 + $0x60] sm:$0xff]  ;;  %v129_v34 = vld [vmem:[#allocation6 + $0x68] sm:$0xff] }
  0x20   :  { %64 = vst.msk [vmem:[#allocation3 + $0x60] sm:$0xff] %vm2712_vm0, %v2727_v0  ;;  %65 = vst.msk [vmem:[#allocation3 + $0x68] sm:$0xff] %vm2712_vm0, %v2727_v0  ;;  %1422 = vmatprep.subr.bf16.mxu0 %v1421_v12  ;;  %1447 = vmatprep.subr.bf16.mxu1 %v1421_v12  ;;  %v744_v35 = vld [vmem:[%s2707_s0 + $0x48] sm:$0xff]  ;;  %v1437_v36 = vpack.c.bf16 %v129_v34, %v128_v33  ;;  %v746_v37 = vld [vmem:[%s2707_s0 + $0x58] sm:$0xff] }
  0x21   :  { %66 = vst.msk [vmem:[#allocation3 + $0x70] sm:$0xff] %vm2712_vm0, %v2727_v0  ;;  %67 = vst.msk [vmem:[#allocation3 + $0x78] sm:$0xff] %vm2712_vm0, %v2727_v0  ;;  %762 = vperm.xlu0 %1468, %v738_v17   ;;  %v130_v38 = vld [vmem:[#allocation6 + $0x70] sm:$0xff]  ;;  %v131_v39 = vld [vmem:[#allocation6 + $0x78] sm:$0xff] }
  0x22   :  { %68 = vst.msk [vmem:[#allocation4] sm:$0xff] %vm2712_vm0, %v2727_v0  ;;  %69 = vst.msk [vmem:[#allocation4 + $0x8] sm:$0xff] %vm2712_vm0, %v2727_v0  ;;  %798 = vperm.xlu1 %1467, %v750_v25   ;;  %v747_v40 = vld [vmem:[%s2707_s0 + $0x60] sm:$0xff]  ;;  %v1441_v41 = vpack.c.bf16 %v131_v39, %v130_v38  ;;  %v748_v42 = vld [vmem:[%s2707_s0 + $0x68] sm:$0xff] }
  0x23   :  { %70 = vst.msk [vmem:[#allocation4 + $0x10] sm:$0xff] %vm2712_vm0, %v2727_v0  ;;  %71 = vst.msk [vmem:[#allocation4 + $0x18] sm:$0xff] %vm2712_vm0, %v2727_v0  ;;  %v749_v43 = vld [vmem:[%s2707_s0 + $0x70] sm:$0xff]  ;;  %v101_v44 = vld [vmem:[%s2709_s2 + $0x8] sm:$0xff] }
  0x24   :  { %72 = vst.msk [vmem:[#allocation4 + $0x20] sm:$0xff] %vm2712_vm0, %v2727_v0  ;;  %73 = vst.msk [vmem:[#allocation4 + $0x28] sm:$0xff] %vm2712_vm0, %v2727_v0  ;;  %v109_v45 = vld [vmem:[%s2709_s2 + $0x48] sm:$0xff]  ;;  %v102_v46 = vld [vmem:[%s2709_s2 + $0x10] sm:$0xff] }
  0x25   :  { %74 = vst.msk [vmem:[#allocation4 + $0x30] sm:$0xff] %vm2712_vm0, %v2727_v0  ;;  %75 = vst.msk [vmem:[#allocation4 + $0x38] sm:$0xff] %vm2712_vm0, %v2727_v0  ;;  %765 = vperm.xlu0 %1468, %v739_v20   ;;  %v110_v47 = vld [vmem:[%s2709_s2 + $0x50] sm:$0xff]  ;;  %v103_v48 = vld [vmem:[%s2709_s2 + $0x18] sm:$0xff]  ;;  %v292_v20 = vadd.s32 64, %v1870_v59 }
  0x26   :  { %76 = vst.msk [vmem:[#allocation4 + $0x40] sm:$0xff] %vm2712_vm0, %v2727_v0  ;;  %77 = vst.msk [vmem:[#allocation4 + $0x48] sm:$0xff] %vm2712_vm0, %v2727_v0  ;;  %v111_v49 = vld [vmem:[%s2709_s2 + $0x58] sm:$0xff]  ;;  %v104_v50 = vld [vmem:[%s2709_s2 + $0x20] sm:$0xff] }
  0x27   :  { %78 = vst.msk [vmem:[#allocation4 + $0x50] sm:$0xff] %vm2712_vm0, %v2727_v0  ;;  %79 = vst.msk [vmem:[#allocation4 + $0x58] sm:$0xff] %vm2712_vm0, %v2727_v0  ;;  %1424 = vmatpush3.bf16.xpose.msra.mxu0 %v1421_v12  ;;  %1455 = vmatpush3.bf16.xpose.msra.mxu1 %v1421_v12  ;;  %v112_v51 = vld [vmem:[%s2709_s2 + $0x60] sm:$0xff]  ;;  %v105_v52 = vld [vmem:[%s2709_s2 + $0x28] sm:$0xff]  ;;  %vm325_vm15 = vcmp.ne.s32.totalorder %v292_v20, %v1872_v60  ;;  %v294_v20 = vadd.s32 80, %v1870_v59 }
  0x28   :  { %80 = vst.msk [vmem:[#allocation4 + $0x60] sm:$0xff] %vm2712_vm0, %v2727_v0  ;;  %81 = vst.msk [vmem:[#allocation4 + $0x68] sm:$0xff] %vm2712_vm0, %v2727_v0  ;;  %1426 = vmatprep.subr.bf16.mxu0 %v1425_v19  ;;  %1448 = vmatprep.subr.bf16.mxu1 %v1425_v19  ;;  %v113_v53 = vld [vmem:[%s2709_s2 + $0x68] sm:$0xff]  ;;  %v106_v54 = vld [vmem:[%s2709_s2 + $0x30] sm:$0xff] }
  0x29   :  { %82 = vst.msk [vmem:[#allocation4 + $0x70] sm:$0xff] %vm2712_vm0, %v2727_v0  ;;  %83 = vst.msk [vmem:[#allocation4 + $0x78] sm:$0xff] %vm2712_vm0, %v2727_v0  ;;  %768 = vperm.xlu0 %1468, %v740_v24   ;;  %v114_v55 = vld [vmem:[%s2709_s2 + $0x70] sm:$0xff]  ;;  %v107_v56 = vld [vmem:[%s2709_s2 + $0x38] sm:$0xff] }
  0x2a   :  { %84 = vst.msk [vmem:[#allocation5] sm:$0xff] %vm2712_vm0, %v2727_v0  ;;  %85 = vst.msk [vmem:[#allocation5 + $0x8] sm:$0xff] %vm2712_vm0, %v2727_v0  ;;  %v115_v57 = vld [vmem:[%s2709_s2 + $0x78] sm:$0xff]  ;;  %v1883_v62 = vld [vmem:[%s2708_s1] ss:$0 sm:$0xff] }
  0x2b   :  { %86 = vst.msk [vmem:[#allocation5 + $0x10] sm:$0xff] %vm2712_vm0, %v2727_v0  ;;  %87 = vst.msk [vmem:[#allocation5 + $0x18] sm:$0xff] %vm2712_vm0, %v2727_v0 }
  0x2c   :  { %88 = vst.msk [vmem:[#allocation5 + $0x20] sm:$0xff] %vm2712_vm0, %v2727_v0  ;;  %89 = vst.msk [vmem:[#allocation5 + $0x28] sm:$0xff] %vm2712_vm0, %v2727_v0 }
  0x2d   :  { %90 = vst.msk [vmem:[#allocation5 + $0x30] sm:$0xff] %vm2712_vm0, %v2727_v0  ;;  %91 = vst.msk [vmem:[#allocation5 + $0x38] sm:$0xff] %vm2712_vm0, %v2727_v0  ;;  %771 = vperm.xlu0 %1468, %v741_v27  }
  0x2e   :  { %92 = vst.msk [vmem:[#allocation5 + $0x40] sm:$0xff] %vm2712_vm0, %v2727_v0  ;;  %93 = vst.msk [vmem:[#allocation5 + $0x48] sm:$0xff] %vm2712_vm0, %v2727_v0 }
  0x2f   :  { %94 = vst.msk [vmem:[#allocation5 + $0x50] sm:$0xff] %vm2712_vm0, %v2727_v0  ;;  %95 = vst.msk [vmem:[#allocation5 + $0x58] sm:$0xff] %vm2712_vm0, %v2727_v0  ;;  %1428 = vmatpush3.bf16.xpose.msra.mxu0 %v1425_v19  ;;  %1456 = vmatpush3.bf16.xpose.msra.mxu1 %v1425_v19  ;;  %v1570_v19 = vmov -1e+30  }
  0x30   :  { %96 = vst.msk [vmem:[#allocation5 + $0x60] sm:$0xff] %vm2712_vm0, %v2727_v0  ;;  %97 = vst.msk [vmem:[#allocation5 + $0x68] sm:$0xff] %vm2712_vm0, %v2727_v0  ;;  %1430 = vmatprep.subr.bf16.mxu0 %v1429_v26  ;;  %1449 = vmatprep.subr.bf16.mxu1 %v1429_v26 }
  0x31   :  { %98 = vst.msk [vmem:[#allocation5 + $0x70] sm:$0xff] %vm2712_vm0, %v2727_v0  ;;  %99 = vst.msk [vmem:[#allocation5 + $0x78] sm:$0xff] %vm2712_vm0, %v2727_v0  ;;  %774 = vperm.xlu0 %1468, %v742_v30  }
  0x32   :  { %2755 = vst [vmem:[#allocation9_spill] sm:$0xff] %v1875_v61  ;;  %vm1887_vm3 = vmand %vm318_vm1, %vm2726_vm2 }
  0x33   :  { %v2757_v63 = vsel %vm1887_vm3, 4294967295, %v2756_v63  ;;  %vm1907_vm7 = vmand %vm317_vm6, %vm2726_vm2  ;;  %45 = vst.msk [vmem:[#allocation2 + $0x48] sm:$0xff] %vm2712_vm0, %v1570_v19  ;;  %vm326_vm6 = vcmp.ne.s32.totalorder %v293_v22, %v1872_v60 }
  0x34   :  { %v2761_v5 = vsel %vm1907_vm7, 4294967295, %v2760_v5  ;;  %36 = vst.msk [vmem:[#allocation2] sm:$0xff] %vm2712_vm0, %v1570_v19  ;;  %37 = vst.msk [vmem:[#allocation2 + $0x8] sm:$0xff] %vm2712_vm0, %v1570_v19 }
  0x35   :  { %777 = vperm.xlu0 %1468, %v743_v32   ;;  %38 = vst.msk [vmem:[#allocation2 + $0x10] sm:$0xff] %vm2712_vm0, %v1570_v19  ;;  %39 = vst.msk [vmem:[#allocation2 + $0x18] sm:$0xff] %vm2712_vm0, %v1570_v19 }
  0x36   :  { %40 = vst.msk [vmem:[#allocation2 + $0x20] sm:$0xff] %vm2712_vm0, %v1570_v19  ;;  %41 = vst.msk [vmem:[#allocation2 + $0x28] sm:$0xff] %vm2712_vm0, %v1570_v19 }
  0x37   :  { %1432 = vmatpush3.bf16.xpose.msra.mxu0 %v1429_v26  ;;  %1457 = vmatpush3.bf16.xpose.msra.mxu1 %v1429_v26  ;;  %42 = vst.msk [vmem:[#allocation2 + $0x30] sm:$0xff] %vm2712_vm0, %v1570_v19  ;;  %43 = vst.msk [vmem:[#allocation2 + $0x38] sm:$0xff] %vm2712_vm0, %v1570_v19  ;;  %v297_v26 = vadd.s32 104, %v1870_v59 }
  0x38   :  { %1434 = vmatprep.subr.bf16.mxu0 %v1433_v31  ;;  %1450 = vmatprep.subr.bf16.mxu1 %v1433_v31  ;;  %44 = vst.msk [vmem:[#allocation2 + $0x40] sm:$0xff] %vm2712_vm0, %v1570_v19  ;;  %46 = vst.msk [vmem:[#allocation2 + $0x50] sm:$0xff] %vm2712_vm0, %v1570_v19 }
  0x39   :  { %780 = vperm.xlu0 %1468, %v744_v35   ;;  %47 = vst.msk [vmem:[#allocation2 + $0x58] sm:$0xff] %vm2712_vm0, %v1570_v19  ;;  %48 = vst.msk [vmem:[#allocation2 + $0x60] sm:$0xff] %vm2712_vm0, %v1570_v19 }
  0x3a   :  { %49 = vst.msk [vmem:[#allocation2 + $0x68] sm:$0xff] %vm2712_vm0, %v1570_v19  ;;  %50 = vst.msk [vmem:[#allocation2 + $0x70] sm:$0xff] %vm2712_vm0, %v1570_v19 }
  0x3b   :  { %51 = vst.msk [vmem:[#allocation2 + $0x78] sm:$0xff] %vm2712_vm0, %v1570_v19  ;;  %v2323_v61 = vld [vmem:[#allocation2] sm:$0xff] }
  0x3c   :  { %2823 = vst [vmem:[#allocation14_spill] sm:$0xff] %v2323_v61 }
  0x3d   :  { %786 = vperm.xlu0 %1468, %v746_v37  }
  0x3f   :  { %1436 = vmatpush3.bf16.xpose.msra.mxu0 %v1433_v31  ;;  %1458 = vmatpush3.bf16.xpose.msra.mxu1 %v1433_v31  ;;  %v2764_v31 = vmov 0 }
  0x40   :  { %1438 = vmatprep.subr.bf16.mxu0 %v1437_v36  ;;  %1451 = vmatprep.subr.bf16.mxu1 %v1437_v36 }
  0x41   :  { %789 = vperm.xlu0 %1468, %v747_v40  }
  0x45   :  { %792 = vperm.xlu0 %1468, %v748_v42  }
  0x47   :  { %1440 = vmatpush3.bf16.xpose.msra.mxu0 %v1437_v36  ;;  %1459 = vmatpush3.bf16.xpose.msra.mxu1 %v1437_v36  ;;  %v933_v36 = vld [vmem:[#allocation5 + $0x8] sm:$0xff] }
  0x48   :  { %1442 = vmatprep.subr.bf16.mxu0 %v1441_v41  ;;  %1452 = vmatprep.subr.bf16.mxu1 %v1441_v41 }
  0x49   :  { %795 = vperm.xlu0 %1468, %v749_v43  }
  0x4f   :  { %1444 = vmatpush3.bf16.xpose.msra.mxu0 %v1441_v41  ;;  %1460 = vmatpush3.bf16.xpose.msra.mxu1 %v1441_v41  ;;  %v2768_v41 = vmov 0 }
  0x56   :  { %1390 = vmatmul.mubr.f32.vlgmr.msra.gmra.mrb[0].mxu0 %v101_v44  ;;  %1402 = vmatmul.mubr.f32.vlgmr.msra.gmra.mrb[0].mxu1 %v109_v45  ;;  %v2770_v44 = vmov 0 }
  0x57   :  { %1392 = vmatprep.mubr.f32.mxu0 %v102_v46  ;;  %1404 = vmatprep.mubr.f32.mxu1 %v110_v47  ;;  %v2772_v47 = vmov 0 }
  0x5a   :  { %1393 = vmatmul.mubr.f32.gmra.mrb[2].mxu0 %v103_v48  ;;  %1405 = vmatmul.mubr.f32.gmra.mrb[2].mxu1 %v111_v49 }
  0x5b   :  { %1395 = vmatprep.mubr.f32.mxu0 %v104_v50  ;;  %1407 = vmatprep.mubr.f32.mxu1 %v112_v51  ;;  %v932_v51 = vld [vmem:[#allocation5] sm:$0xff] }
  0x5e   :  { %1396 = vmatmul.mubr.f32.gmra.mrb[4].mxu0 %v105_v52  ;;  %1408 = vmatmul.mubr.f32.gmra.mrb[4].mxu1 %v113_v53 }
  0x5f   :  { %1398 = vmatprep.mubr.f32.mxu0 %v106_v54  ;;  %1410 = vmatprep.mubr.f32.mxu1 %v114_v55 }
  0x62   :  { %1399 = vmatmul.mubr.f32.gmra.mrb[6].mxu0 %v107_v56  ;;  %1411 = vmatmul.mubr.f32.gmra.mrb[6].mxu1 %v115_v57  ;;  %v286_v56 = vadd.s32 16, %v1870_v59 }
  0x98   :  { %v757_v1 = vpop.permute.xlu0 %756 }
  0x99   :  { %vm805_vm4 = vcmp.eq.s32.totalorder %v757_v1, %v1883_v62  ;;  %v754_v6 = vpop.permute.xlu1 %753 }
  0x9a   :  { %vm1894_vm5 = vmand %vm805_vm4, %vm1887_vm3  ;;  %vm804_vm8 = vcmp.eq.s32.totalorder %v754_v6, %v1883_v62  ;;  %v2316_v6 = vld [vmem:[#allocation2 + $0x18] sm:$0xff] }
  0x9b   :  { %v1310_v3 = vsel %vm1894_vm5, 1.0, %v2727_v0  ;;  %vm1916_vm9 = vmand %vm804_vm8, %vm1907_vm7  ;;  %vm329_vm8 = vcmp.ne.s32.totalorder %v296_v23, %v1872_v60  ;;  %2820 = vst [vmem:[#allocation13_spill] sm:$0xff] %v2316_v6 }
  0x9c   :  { %v1903_v4 = vpop.permute.xlu0 %759  ;;  %982 = vadd.xlane.f32.xlu1 %v1310_v3  ;;  %v1309_v9 = vsel %vm1916_vm9, 1.0, %v2727_v0  ;;  %vm1989_vm4 = vmand %vm325_vm15, %vm2726_vm2  ;;  %vm330_vm15 = vcmp.ne.s32.totalorder %v297_v26, %v1872_v60  ;;  %v2780_v26 = vmov 0 }
  0x9d   :  { %980 = vadd.xlane.f32.xlu0 %v1309_v9  ;;  %v1966_v21 = vpop.permute.xlu1 %783  ;;  %v2765_v31 = vsel %vm1989_vm4, 4294967295, %v2764_v31  ;;  %vm2032_vm10 = vmand %vm329_vm8, %vm2726_vm2 }
  0x9e   :  { %v2771_v44 = vsel %vm2032_vm10, 4294967295, %v2770_v44  ;;  %vm814_vm7 = vcmp.eq.s32.totalorder %v1966_v21, %v1883_v62 }
  0xa0   :  { %v1912_v7 = vpop.permute.xlu0 %762 }
  0xa1   :  { %v1993_v32 = vpop.permute.xlu1 %798 }
  0xa4   :  { %v1923_v10 = vpop.permute.xlu0 %765 }
  0xa8   :  { %v1927_v11 = vpop.permute.xlu0 %768 }
  0xac   :  { %v1929_v12 = vpop.permute.xlu0 %771 }
  0xb0   :  { %v1933_v13 = vpop.permute.xlu0 %774 }
  0xb4   :  { %v778_v14 = vpop.permute.xlu0 %777 }
  0xb5   :  { %vm812_vm1 = vcmp.eq.s32.totalorder %v778_v14, %v1883_v62 }
  0xb6   :  { %vm2003_vm12 = vmand %vm812_vm1, %vm1989_vm4  ;;  %vm807_vm4 = vcmp.eq.s32.totalorder %v1912_v7, %v1883_v62  ;;  %v2786_v7 = vmov 0 }
  0xb7   :  { %vm2022_vm1 = vmand %vm326_vm6, %vm2726_vm2 }
  0xb8   :  { %v1937_v15 = vpop.permute.xlu0 %780  ;;  %v2769_v41 = vsel %vm2022_vm1, 4294967295, %v2768_v41 }
  0xb9   :  { %vm813_vm11 = vcmp.eq.s32.totalorder %v1937_v15, %v1883_v62  ;;  %v287_v15 = vadd.s32 24, %v1870_v59 }
  0xba   :  { %vm2054_vm6 = vmand %vm813_vm11, %vm2022_vm1 }
  0xbc   :  { %v1939_v16 = vpop.permute.xlu0 %786 }
  0xc0   :  { %v1941_v17 = vpop.permute.xlu0 %789 }
  0xc1   :  { %vm816_vm13 = vcmp.eq.s32.totalorder %v1941_v17, %v1883_v62 }
  0xc2   :  { %vm2071_vm11 = vmand %vm816_vm13, %vm2032_vm10  ;;  %vm319_vm13 = vcmp.ne.s32.totalorder %v286_v56, %v1872_v60  ;;  %vm327_vm10 = vcmp.ne.s32.totalorder %v294_v20, %v1872_v60 }
  0xc4   :  { %v1945_v18 = vpop.permute.xlu0 %792 }
  0xc5   :  { %vm817_vm14 = vcmp.eq.s32.totalorder %v1945_v18, %v1883_v62 }
  0xc8   :  { %v2026_v42 = vpop.permute.xlu0 %795 }
 0x129   :  { %v1971_v24 = vpop.f32.mrb[0].mxu0  ;;  %v1973_v25 = vpop.f32.mrb[0].mxu1 }
 0x12a   :  { %v1977_v27 = vpop.f32.mrb[1].mxu0  ;;  %v1979_v28 = vpop.f32.mrb[1].mxu1  ;;  %v359_v29 = vsel %vm2726_vm2, %v1973_v25, -1e+30  ;;  %v351_v30 = vsel %vm2726_vm2, %v1971_v24, -1e+30 }
 0x12b   :  { %384 = vmax.xlane.f32.xlu1 %v359_v29  ;;  %368 = vmax.xlane.f32.xlu0 %v351_v30  ;;  %v860_v39 = vsel %vm2003_vm12, %v1979_v28, 0.0  ;;  %v853_v40 = vsel %vm1894_vm5, %v1971_v24, 0.0  ;;  %v983_v43 = vpop.xlane.xlu1 %982  ;;  %vm2041_vm5 = vmand %vm330_vm15, %vm2726_vm2  ;;  %v861_v54 = vsel %vm2054_vm6, %v1973_v25, 0.0  ;;  %v981_v57 = vpop.xlane.xlu0 %980  ;;  %v350_v19 = vsel %vm2726_vm2, %v1977_v27, -1e+30 }
 0x12c   :  { %v1013_v46 = vadd.f32 %v983_v43, %v933_v36  ;;  %v2773_v47 = vsel %vm2041_vm5, 4294967295, %v2772_v47  ;;  %vm2081_vm8 = vmand %vm817_vm14, %vm2041_vm5  ;;  %v1012_v2 = vadd.f32 %v981_v57, %v932_v51  ;;  %vm320_vm14 = vcmp.ne.s32.totalorder %v287_v15, %v1872_v60 }
 0x12d   :  { %v1997_v33 = vpop.f32.mrb[2].mxu0  ;;  %v1999_v34 = vpop.f32.mrb[2].mxu1  ;;  %vm806_vm15 = vcmp.eq.s32.totalorder %v1903_v4, %v1883_v62  ;;  %v358_v23 = vsel %vm2726_vm2, %v1979_v28, -1e+30  ;;  %v295_v29 = vadd.s32 88, %v1870_v59  ;;  %vm2128_vm5 = vmand %vm320_vm14, %vm2726_vm2  ;;  %v2782_v4 = vmov 0 }
 0x12e   :  { %v2010_v37 = vpop.f32.mrb[3].mxu0  ;;  %v2012_v38 = vpop.f32.mrb[3].mxu1  ;;  %v353_v45 = vsel %vm2726_vm2, %v1997_v33, -1e+30  ;;  %1029 = vst.msk [vmem:[#allocation5 + $0x8] sm:$0xff] %vm2712_vm0, %v1013_v46  ;;  %1028 = vst.msk [vmem:[#allocation5] sm:$0xff] %vm2712_vm0, %v1012_v2 }
 0x12f   :  { %884 = vadd.xlane.f32.xlu1 %v860_v39  ;;  %870 = vadd.xlane.f32.xlu0 %v853_v40  ;;  %v361_v1 = vsel %vm2726_vm2, %v1999_v34, -1e+30  ;;  %v352_v22 = vsel %vm2726_vm2, %v2010_v37, -1e+30  ;;  %vm2120_vm0 = vmand %vm319_vm13, %vm2726_vm2  ;;  %v2783_v4 = vsel %vm2128_vm5, 4294967295, %v2782_v4  ;;  %v852_v36 = vsel %vm1916_vm9, %v1977_v27, 0.0 }
 0x130   :  { %v2781_v26 = vsel %vm2120_vm0, 4294967295, %v2780_v26  ;;  %vm2136_vm13 = vmand %vm806_vm15, %vm2120_vm0  ;;  %vm328_vm15 = vcmp.ne.s32.totalorder %v295_v29, %v1872_v60  ;;  %v288_v46 = vadd.s32 32, %v1870_v59  ;;  %v360_v2 = vsel %vm2726_vm2, %v2012_v38, -1e+30 }
 0x131   :  { %v2045_v48 = vpop.f32.mrb[4].mxu0  ;;  %v2047_v49 = vpop.f32.mrb[4].mxu1  ;;  %v854_v39 = vsel %vm2136_vm13, %v2010_v37, 0.0  ;;  %vm2150_vm14 = vmand %vm327_vm10, %vm2726_vm2  ;;  %vm815_vm10 = vcmp.eq.s32.totalorder %v1939_v16, %v1883_v62  ;;  %v289_v16 = vadd.s32 40, %v1870_v59  ;;  %v2798_v15 = vmov 0 }
 0x132   :  { %v2058_v52 = vpop.f32.mrb[5].mxu0  ;;  %v2060_v53 = vpop.f32.mrb[5].mxu1  ;;  %v2787_v7 = vsel %vm2150_vm14, 4294967295, %v2786_v7  ;;  %vm2157_vm0 = vmand %vm807_vm4, %vm2128_vm5  ;;  %v355_v51 = vsel %vm2726_vm2, %v2045_v48, -1e+30 }
 0x133   :  { %886 = vadd.xlane.f32.xlu0 %v861_v54  ;;  %372 = vmax.xlane.f32.xlu1 %v353_v45  ;;  %vm2163_vm9 = vmand %vm814_vm7, %vm2150_vm14  ;;  %v855_v40 = vsel %vm2157_vm0, %v1997_v33, 0.0  ;;  %v2792_v45 = vmov 0  ;;  %vm322_vm14 = vcmp.ne.s32.totalorder %v289_v16, %v1872_v60  ;;  %v363_v57 = vsel %vm2726_vm2, %v2047_v49, -1e+30 }
 0x134   :  { %v2791_v8 = vsel %vm2163_vm9, 4294967295, %v2790_v8  ;;  %v862_v43 = vsel %vm2163_vm9, %v2012_v38, 0.0  ;;  %vm2177_vm4 = vmand %vm328_vm15, %vm2726_vm2  ;;  %vm321_vm15 = vcmp.ne.s32.totalorder %v288_v46, %v1872_v60  ;;  %v2807_v46 = vmov 0 }
 0x135   :  { %v2094_v9 = vpop.f32.mrb[6].mxu0  ;;  %v2096_v14 = vpop.f32.mrb[6].mxu1  ;;  %v2793_v45 = vsel %vm2177_vm4, 4294967295, %v2792_v45  ;;  %vm2188_vm7 = vmand %vm815_vm10, %vm2177_vm4  ;;  %vm809_vm4 = vcmp.eq.s32.totalorder %v1927_v11, %v1883_v62  ;;  %vm2812_vm9 = vcmp.eq.s32.totalorder %v1933_v13, %v1883_v62 }
 0x136   :  { %v2099_v17 = vpop.f32.mrb[7].mxu0  ;;  %v2101_v18 = vpop.f32.mrb[7].mxu1  ;;  %v863_v56 = vsel %vm2188_vm7, %v1999_v34, 0.0  ;;  %vm2202_vm10 = vmand %vm321_vm15, %vm2726_vm2  ;;  %vm2800_vm15 = vcmp.eq.s32.totalorder %v1923_v10, %v1883_v62  ;;  %v290_v10 = vadd.s32 48, %v1870_v59  ;;  %v357_v29 = vsel %vm2726_vm2, %v2094_v9, -1e+30 }
 0x137   :  { %366 = vmax.xlane.f32.xlu0 %v350_v19  ;;  %388 = vmax.xlane.f32.xlu1 %v361_v1  ;;  %v2796_v1 = vmov 0  ;;  %vm2213_vm5 = vmand %vm322_vm14, %vm2726_vm2  ;;  %v364_v13 = vsel %vm2726_vm2, %v2101_v18, -1e+30 }
 0x138   :  { %v2797_v1 = vsel %vm2202_vm10, 4294967295, %v2796_v1  ;;  %v2799_v15 = vsel %vm2213_vm5, 4294967295, %v2798_v15  ;;  %vm2222_vm3 = vmand %vm2800_vm15, %vm2202_vm10  ;;  %vm323_vm14 = vcmp.ne.s32.totalorder %v290_v10, %v1872_v60 }
 0x139   :  { %vm2228_vm1 = vmand %vm809_vm4, %vm2213_vm5 }
 0x13a   :  { %v857_v20 = vsel %vm2228_vm1, %v2045_v48, 0.0  ;;  %vm2253_vm15 = vmand %vm323_vm14, %vm2726_vm2  ;;  %vm2809_vm14 = vcmp.eq.s32.totalorder %v1929_v12, %v1883_v62 }
 0x13b   :  { %382 = vmax.xlane.f32.xlu0 %v358_v23  ;;  %370 = vmax.xlane.f32.xlu1 %v352_v22  ;;  %v856_v22 = vsel %vm2222_vm3, %v2058_v52, 0.0  ;;  %v291_v23 = vadd.s32 56, %v1870_v59  ;;  %vm2271_vm5 = vmand %vm2809_vm14, %vm2253_vm15 }
 0x13c   :  { %v858_v12 = vsel %vm2271_vm5, %v2099_v17, 0.0 }
 0x13d   :  { %vm324_vm4 = vcmp.ne.s32.totalorder %v291_v23, %v1872_v60 }
 0x13e   :  { %vm2262_vm10 = vmand %vm324_vm4, %vm2726_vm2 }
 0x13f   :  { %868 = vadd.xlane.f32.xlu0 %v852_v36  ;;  %872 = vadd.xlane.f32.xlu1 %v854_v39  ;;  %v354_v36 = vsel %vm2726_vm2, %v2058_v52, -1e+30  ;;  %v365_v39 = vsel %vm2726_vm2, %v2096_v14, -1e+30  ;;  %v2808_v46 = vsel %vm2262_vm10, 4294967295, %v2807_v46  ;;  %vm2280_vm4 = vmand %vm2812_vm9, %vm2262_vm10  ;;  %vm2818_vm9 = vcmask 7168  }
 0x140   :  { %vm2819_vm14 = vmmov %vm2818_vm9 }
 0x143   :  { %874 = vadd.xlane.f32.xlu0 %v855_v40  ;;  %888 = vadd.xlane.f32.xlu1 %v862_v43  ;;  %v2805_v40 = vmov 0  ;;  %v362_v43 = vsel %vm2726_vm2, %v2060_v53, -1e+30 }
 0x144   :  { %v2806_v40 = vsel %vm2253_vm15, 4294967295, %v2805_v40 }
 0x147   :  { %890 = vadd.xlane.f32.xlu0 %v863_v56  ;;  %376 = vmax.xlane.f32.xlu1 %v355_v51  ;;  %v859_v56 = vsel %vm2280_vm4, %v2094_v9, 0.0 }
 0x14b   :  { %386 = vmax.xlane.f32.xlu0 %v360_v2  ;;  %392 = vmax.xlane.f32.xlu1 %v363_v57  ;;  %v356_v57 = vsel %vm2726_vm2, %v2099_v17, -1e+30  ;;  %v2296_v2 = vld [vmem:[#allocation2 + $0x48] sm:$0xff]  ;;  %vm2821_vm2 = vmmov %vm2818_vm9 }
 0x14c   :  { %vm2826_vm15 = vmmov %vm2821_vm2 }
 0x14f   :  { %878 = vadd.xlane.f32.xlu0 %v857_v20  ;;  %876 = vadd.xlane.f32.xlu1 %v856_v22  ;;  %v2298_v20 = vld [vmem:[#allocation2 + $0x8] sm:$0xff] }
 0x150   :  { %2815 = vst [vmem:[#allocation10_spill] sm:$0xff] %v2298_v20 }
 0x153   :  { %374 = vmax.xlane.f32.xlu0 %v354_v36  ;;  %380 = vmax.xlane.f32.xlu1 %v357_v29  ;;  %v844_v36 = vld [vmem:[#allocation4 + $0x40] sm:$0xff] }
 0x157   :  { %390 = vmax.xlane.f32.xlu0 %v362_v43  ;;  %396 = vmax.xlane.f32.xlu1 %v365_v39  ;;  %v837_v39 = vld [vmem:[#allocation4 + $0x8] sm:$0xff] }
 0x15b   :  { %882 = vadd.xlane.f32.xlu0 %v859_v56  ;;  %880 = vadd.xlane.f32.xlu1 %v858_v12 }
 0x15f   :  { %378 = vmax.xlane.f32.xlu0 %v356_v57 }
 0x163   :  { %394 = vmax.xlane.f32.xlu0 %v364_v13 }
 0x1b8   :  { %v385_v22 = vpop.xlane.xlu1 %384  ;;  %v369_v10 = vpop.xlane.xlu0 %368 }
 0x1b9   :  { %v2301_v23 = vmax.f32 %v2296_v2, %v385_v22  ;;  %v2304_v29 = vmax.f32 %v2298_v20, %v369_v10  ;;  %v845_v10 = vld [vmem:[#allocation4 + $0x48] sm:$0xff]  ;;  %v839_v20 = vld [vmem:[#allocation4 + $0x18] sm:$0xff] }
 0x1bb   :  { %2816 = vst [vmem:[#allocation11_spill] sm:$0xff] %v2301_v23  ;;  %2817 = vst [vmem:[#allocation12_spill] sm:$0xff] %v2304_v29  ;;  %525 = vperm.xlu0 %1468, %v2301_v23   ;;  %485 = vperm.xlu1 %1467, %v2304_v29  }
 0x1bc   :  { %728 = vst.msk [vmem:[#allocation2 + $0x48] sm:$0xff] %vm2818_vm9, %v2301_v23  ;;  %v885_v12 = vpop.xlane.xlu1 %884  ;;  %v871_v57 = vpop.xlane.xlu0 %870  ;;  %vm2822_vm9 = vmmov %vm2821_vm2  ;;  %v846_v23 = vld [vmem:[#allocation4 + $0x50] sm:$0xff] }
 0x1bd   :  { %720 = vst.msk [vmem:[#allocation2 + $0x8] sm:$0xff] %vm2819_vm14, %v2304_v29  ;;  %v908_v13 = vadd.f32 %v885_v12, %v844_v36  ;;  %v901_v22 = vadd.f32 %v871_v57, %v837_v39  ;;  %v2325_v29 = vld [vmem:[#allocation2 + $0x58] sm:$0xff]  ;;  %vm2825_vm14 = vmmov %vm2821_vm2 }
 0x1be   :  { %2824 = vst [vmem:[#allocation15_spill] sm:$0xff] %v2325_v29 }
 0x1bf   :  { %924 = vst.msk [vmem:[#allocation4 + $0x40] sm:$0xff] %vm2821_vm2, %v908_v13  ;;  %v836_v13 = vld [vmem:[#allocation4] sm:$0xff] }
 0x1c0   :  { %917 = vst.msk [vmem:[#allocation4 + $0x8] sm:$0xff] %vm2822_vm9, %v901_v22  ;;  %v887_v43 = vpop.xlane.xlu0 %886  ;;  %v373_v56 = vpop.xlane.xlu1 %372  ;;  %v2349_v22 = vld [vmem:[#allocation2 + $0x10] sm:$0xff]  ;;  %vm2833_vm9 = vmmov %vm2821_vm2 }
 0x1c1   :  { %v909_v0 = vadd.f32 %v887_v43, %v845_v10  ;;  %v2321_v3 = vmax.f32 %v2316_v6, %v373_v56  ;;  %v2338_v56 = vld [vmem:[#allocation2 + $0x40] sm:$0xff]  ;;  %2831 = vst [vmem:[#allocation19_spill] sm:$0xff] %v2349_v22  ;;  %v838_v6 = vld [vmem:[#allocation4 + $0x10] sm:$0xff] }
 0x1c2   :  { %2829 = vst [vmem:[#allocation18_spill] sm:$0xff] %v2338_v56 }
 0x1c3   :  { %925 = vst.msk [vmem:[#allocation4 + $0x48] sm:$0xff] %vm2825_vm14, %v909_v0  ;;  %vm2834_vm14 = vmmov %vm2821_vm2 }
 0x1c4   :  { %722 = vst.msk [vmem:[#allocation2 + $0x18] sm:$0xff] %vm2826_vm15, %v2321_v3  ;;  %v367_v39 = vpop.xlane.xlu0 %366  ;;  %v389_v12 = vpop.xlane.xlu1 %388  ;;  %vm2830_vm15 = vmmov %vm2821_vm2 }
 0x1c5   :  { %v2333_v57 = vmax.f32 %v2323_v61, %v367_v39  ;;  %v2336_v43 = vmax.f32 %v2325_v29, %v389_v12  ;;  %v847_v29 = vld [vmem:[#allocation4 + $0x58] sm:$0xff] }
 0x1c7   :  { %2827 = vst [vmem:[#allocation16_spill] sm:$0xff] %v2333_v57  ;;  %2828 = vst [vmem:[#allocation17_spill] sm:$0xff] %v2336_v43  ;;  %480 = vperm.xlu0 %1468, %v2333_v57  }
 0x1c8   :  { %719 = vst.msk [vmem:[#allocation2] sm:$0xff] %vm2821_vm2, %v2333_v57  ;;  %v383_v10 = vpop.xlane.xlu0 %382  ;;  %v371_v39 = vpop.xlane.xlu1 %370 }
 0x1c9   :  { %730 = vst.msk [vmem:[#allocation2 + $0x58] sm:$0xff] %vm2830_vm15, %v2336_v43  ;;  %v2352_v12 = vmax.f32 %v2338_v56, %v383_v10  ;;  %v2355_v36 = vmax.f32 %v2349_v22, %v371_v39  ;;  %vm2835_vm15 = vmmov %vm2821_vm2  ;;  %v2370_v22 = vld [vmem:[#allocation2 + $0x28] sm:$0xff] }
 0x1ca   :  { %2836 = vst [vmem:[#allocation21_spill] sm:$0xff] %v2370_v22 }
 0x1cb   :  { %2832 = vst [vmem:[#allocation20_spill] sm:$0xff] %v2352_v12  ;;  %727 = vst.msk [vmem:[#allocation2 + $0x40] sm:$0xff] %vm2833_vm9, %v2352_v12  ;;  %520 = vperm.xlu1 %1467, %v2352_v12   ;;  %535 = vperm.xlu0 %1468, %v2336_v43  }
 0x1cc   :  { %721 = vst.msk [vmem:[#allocation2 + $0x10] sm:$0xff] %vm2834_vm14, %v2355_v36  ;;  %v869_v10 = vpop.xlane.xlu0 %868  ;;  %v873_v39 = vpop.xlane.xlu1 %872  ;;  %vm2837_vm9 = vmmov %vm2821_vm2 }
 0x1cd   :  { %v900_v57 = vadd.f32 %v869_v10, %v836_v13  ;;  %v902_v61 = vadd.f32 %v873_v39, %v838_v6  ;;  %vm2838_vm14 = vmmov %vm2821_vm2  ;;  %v2378_v10 = vld [vmem:[#allocation2 + $0x50] sm:$0xff]  ;;  %v2380_v39 = vld [vmem:[#allocation2 + $0x68] sm:$0xff] }
 0x1ce   :  { %2840 = vst [vmem:[#allocation23_spill] sm:$0xff] %v2378_v10  ;;  %2841 = vst [vmem:[#allocation24_spill] sm:$0xff] %v2380_v39 }
 0x1cf   :  { %916 = vst.msk [vmem:[#allocation4] sm:$0xff] %vm2821_vm2, %v900_v57  ;;  %495 = vperm.xlu1 %1467, %v2321_v3  }
 0x1d0   :  { %918 = vst.msk [vmem:[#allocation4 + $0x10] sm:$0xff] %vm2835_vm15, %v902_v61  ;;  %v875_v0 = vpop.xlane.xlu0 %874  ;;  %v889_v43 = vpop.xlane.xlu1 %888  ;;  %vm2842_vm15 = vmmov %vm2821_vm2 }
 0x1d1   :  { %v903_v12 = vadd.f32 %v875_v0, %v839_v20  ;;  %v910_v56 = vadd.f32 %v889_v43, %v846_v23  ;;  %v841_v0 = vld [vmem:[#allocation4 + $0x28] sm:$0xff] }
 0x1d3   :  { %919 = vst.msk [vmem:[#allocation4 + $0x18] sm:$0xff] %vm2837_vm9, %v903_v12  ;;  %490 = vperm.xlu1 %1467, %v2355_v36   ;;  %v840_v12 = vld [vmem:[#allocation4 + $0x20] sm:$0xff]  ;;  %vm2845_vm9 = vmmov %vm2821_vm2 }
 0x1d4   :  { %926 = vst.msk [vmem:[#allocation4 + $0x50] sm:$0xff] %vm2838_vm14, %v910_v56  ;;  %v891_v6 = vpop.xlane.xlu0 %890  ;;  %v377_v13 = vpop.xlane.xlu1 %376  ;;  %vm2846_vm14 = vmmov %vm2821_vm2 }
 0x1d5   :  { %v911_v57 = vadd.f32 %v891_v6, %v847_v29  ;;  %v2376_v61 = vmax.f32 %v2370_v22, %v377_v13  ;;  %v2403_v22 = vld [vmem:[#allocation2 + $0x20] sm:$0xff]  ;;  %v2405_v6 = vld [vmem:[#allocation2 + $0x38] sm:$0xff] }
 0x1d6   :  { %2847 = vst [vmem:[#allocation27_spill] sm:$0xff] %v2403_v22  ;;  %2848 = vst [vmem:[#allocation28_spill] sm:$0xff] %v2405_v6 }
 0x1d7   :  { %2839 = vst [vmem:[#allocation22_spill] sm:$0xff] %v2376_v61  ;;  %927 = vst.msk [vmem:[#allocation4 + $0x58] sm:$0xff] %vm2821_vm2, %v911_v57 }
 0x1d8   :  { %724 = vst.msk [vmem:[#allocation2 + $0x28] sm:$0xff] %vm2842_vm15, %v2376_v61  ;;  %v387_v23 = vpop.xlane.xlu0 %386  ;;  %v393_v43 = vpop.xlane.xlu1 %392  ;;  %vm2849_vm15 = vmmov %vm2821_vm2 }
 0x1d9   :  { %v2388_v56 = vmax.f32 %v2378_v10, %v387_v23  ;;  %v2391_v29 = vmax.f32 %v2380_v39, %v393_v43  ;;  %v2445_v10 = vld [vmem:[#allocation2 + $0x30] sm:$0xff] }
 0x1db   :  { %2843 = vst [vmem:[#allocation25_spill] sm:$0xff] %v2388_v56  ;;  %2844 = vst [vmem:[#allocation26_spill] sm:$0xff] %v2391_v29  ;;  %530 = vperm.xlu1 %1467, %v2388_v56   ;;  %545 = vperm.xlu0 %1468, %v2391_v29  }
 0x1dc   :  { %729 = vst.msk [vmem:[#allocation2 + $0x50] sm:$0xff] %vm2845_vm9, %v2388_v56  ;;  %v879_v57 = vpop.xlane.xlu0 %878  ;;  %v877_v23 = vpop.xlane.xlu1 %876  ;;  %vm2852_vm9 = vmmov %vm2821_vm2 }
 0x1dd   :  { %732 = vst.msk [vmem:[#allocation2 + $0x68] sm:$0xff] %vm2846_vm14, %v2391_v29  ;;  %v905_v43 = vadd.f32 %v879_v57, %v841_v0  ;;  %v904_v20 = vadd.f32 %v877_v23, %v840_v12  ;;  %v2416_v0 = vld [vmem:[#allocation2 + $0x60] sm:$0xff]  ;;  %v2418_v12 = vld [vmem:[#allocation2 + $0x78] sm:$0xff]  ;;  %vm2853_vm14 = vmmov %vm2821_vm2 }
 0x1de   :  { %2851 = vst [vmem:[#allocation30_spill] sm:$0xff] %v2418_v12  ;;  %v843_v57 = vld [vmem:[#allocation4 + $0x38] sm:$0xff] }
 0x1df   :  { %921 = vst.msk [vmem:[#allocation4 + $0x28] sm:$0xff] %vm2821_vm2, %v905_v43  ;;  %505 = vperm.xlu1 %1467, %v2376_v61  }
 0x1e0   :  { %920 = vst.msk [vmem:[#allocation4 + $0x20] sm:$0xff] %vm2849_vm15, %v904_v20  ;;  %v375_v13 = vpop.xlane.xlu0 %374  ;;  %v381_v39 = vpop.xlane.xlu1 %380  ;;  %vm2855_vm15 = vmmov %vm2821_vm2 }
 0x1e1   :  { %v2411_v56 = vmax.f32 %v2403_v22, %v375_v13  ;;  %v2414_v29 = vmax.f32 %v2405_v6, %v381_v39  ;;  %v842_v22 = vld [vmem:[#allocation4 + $0x30] sm:$0xff] }
 0x1e3   :  { %2850 = vst [vmem:[#allocation29_spill] sm:$0xff] %v2411_v56  ;;  %723 = vst.msk [vmem:[#allocation2 + $0x20] sm:$0xff] %vm2852_vm9, %v2411_v56  ;;  %500 = vperm.xlu1 %1467, %v2411_v56  }
 0x1e4   :  { %726 = vst.msk [vmem:[#allocation2 + $0x38] sm:$0xff] %vm2853_vm14, %v2414_v29  ;;  %v391_v39 = vpop.xlane.xlu0 %390  ;;  %v397_v13 = vpop.xlane.xlu1 %396  ;;  %vm2856_vm9 = vmmov %vm2821_vm2 }
 0x1e5   :  { %v2430_v23 = vmax.f32 %v2416_v0, %v391_v39  ;;  %v2433_v43 = vmax.f32 %v2418_v12, %v397_v13  ;;  %vm2857_vm14 = vmmov %vm2821_vm2  ;;  %v2453_v12 = vld [vmem:[#allocation2 + $0x70] sm:$0xff] }
 0x1e7   :  { %2854 = vst [vmem:[#allocation31_spill] sm:$0xff] %v2433_v43  ;;  %731 = vst.msk [vmem:[#allocation2 + $0x60] sm:$0xff] %vm2821_vm2, %v2430_v23  ;;  %540 = vperm.xlu1 %1467, %v2430_v23   ;;  %555 = vperm.xlu0 %1468, %v2433_v43  }
 0x1e8   :  { %734 = vst.msk [vmem:[#allocation2 + $0x78] sm:$0xff] %vm2855_vm15, %v2433_v43  ;;  %v883_v39 = vpop.xlane.xlu0 %882  ;;  %v881_v13 = vpop.xlane.xlu1 %880  ;;  %vm2858_vm15 = vmmov %vm2821_vm2 }
 0x1e9   :  { %v907_v6 = vadd.f32 %v883_v39, %v843_v57  ;;  %v906_v56 = vadd.f32 %v881_v13, %v842_v22  ;;  %v299_v57 = vadd.s32 120, %v1870_v59  ;;  %v2862_v39 = vsel %vm2081_vm8, %v2047_v49, 0.0 }
 0x1eb   :  { %923 = vst.msk [vmem:[#allocation4 + $0x38] sm:$0xff] %vm2856_vm9, %v907_v6  ;;  %515 = vperm.xlu1 %1467, %v2414_v29   ;;  %vm332_vm9 = vcmp.ne.s32.totalorder %v299_v57, %v1872_v60 }
 0x1ec   :  { %922 = vst.msk [vmem:[#allocation4 + $0x30] sm:$0xff] %vm2857_vm14, %v906_v56  ;;  %v379_v20 = vpop.xlane.xlu0 %378  ;;  %vm819_vm14 = vcmp.eq.s32.totalorder %v1993_v32, %v1883_v62  ;;  %v298_v56 = vadd.s32 112, %v1870_v59  ;;  %v2869_v59 = vsel %vm2071_vm11, %v2060_v53, 0.0 }
 0x1ed   :  { %v2451_v61 = vmax.f32 %v2445_v10, %v379_v20 }
 0x1ef   :  { %725 = vst.msk [vmem:[#allocation2 + $0x30] sm:$0xff] %vm2821_vm2, %v2451_v61  ;;  %510 = vperm.xlu1 %1467, %v2451_v61   ;;  %vm2859_vm2 = vcmp.lt.s32.totalorder %v1872_v60, 16 }
 0x1f0   :  { %v395_v22 = vpop.xlane.xlu0 %394  ;;  %vm2474_vm10 = vmand %vm332_vm9, %vm2859_vm2  ;;  %vm331_vm9 = vcmp.ne.s32.totalorder %v298_v56, %v1872_v60 }
 0x1f1   :  { %v2461_v6 = vmax.f32 %v2453_v12, %v395_v22  ;;  %v2865_v22 = vmov 0.0  }
 0x1f2   :  { %v1312_v57 = vsel %vm2157_vm0, 1.0, %v2865_v22  ;;  %v1316_v43 = vsel %vm2280_vm4, 1.0, %v2865_v22  ;;  %vm2866_vm0 = vmmov %vm2859_vm2  ;;  %v1318_v11 = vsel %vm2054_vm6, 1.0, %v2865_v22  ;;  %v1311_v50 = vsel %vm2136_vm13, 1.0, %v2865_v22 }
 0x1f3   :  { %733 = vst.msk [vmem:[#allocation2 + $0x70] sm:$0xff] %vm2858_vm15, %v2461_v6  ;;  %550 = vperm.xlu1 %1467, %v2461_v6   ;;  %vm2484_vm15 = vmand %vm819_vm14, %vm2474_vm10  ;;  %vm818_vm14 = vcmp.eq.s32.totalorder %v2026_v42, %v1883_v62  ;;  %v1320_v42 = vsel %vm2188_vm7, 1.0, %v2865_v22  ;;  %v1322_v51 = vsel %vm2081_vm8, 1.0, %v2865_v22  ;;  %v1315_v54 = vsel %vm2271_vm5, 1.0, %v2865_v22 }
 0x1f4   :  { %v867_v32 = vsel %vm2484_vm15, %v2096_v14, 0.0  ;;  %vm2506_vm2 = vmand %vm331_vm9, %vm2866_vm0  ;;  %v1317_v30 = vsel %vm2003_vm12, 1.0, %v2865_v22  ;;  %vm2872_vm6 = vnez %v2791_v8  ;;  %v1321_v19 = vsel %vm2071_vm11, 1.0, %v2865_v22 }
 0x1f5   :  { %v1319_v58 = vsel %vm2872_vm6, 1.0, %v2865_v22  ;;  %vm2874_vm12 = vnez %v2757_v63  ;;  %vm2875_vm5 = vnez %v2761_v5  ;;  %vm2876_vm11 = vnez %v2765_v31 }
 0x1f6   :  { %vm2877_vm8 = vnez %v2783_v4  ;;  %vm2878_vm13 = vnez %v2781_v26  ;;  %vm2879_vm7 = vnez %v2793_v45  ;;  %vm2880_vm4 = vnez %v2787_v7 }
 0x1f7   :  { %vm2881_vm9 = vnez %v2799_v15  ;;  %vm2883_vm0 = vnez %v2797_v1  ;;  %vm2884_vm6 = vnez %v2771_v44  ;;  %v1324_v20 = vsel %vm2484_vm15, 1.0, %v2865_v22 }
 0x206   :  { %894 = vadd.xlane.f32.xlu0 %v2862_v39  ;;  %v1314_v39 = vsel %vm2228_vm1, 1.0, %v2865_v22  ;;  %vm2519_vm1 = vmand %vm818_vm14, %vm2506_vm2  ;;  %vm2882_vm14 = vnez %v2773_v47 }
 0x207   :  { %v866_v60 = vsel %vm2519_vm1, %v2101_v18, 0.0 }
 0x20a   :  { %898 = vadd.xlane.f32.xlu0 %v867_v32 }
 0x20e   :  { %986 = vadd.xlane.f32.xlu0 %v1312_v57 }
 0x212   :  { %990 = vadd.xlane.f32.xlu0 %v1314_v39 }
 0x216   :  { %994 = vadd.xlane.f32.xlu0 %v1316_v43  ;;  %v1313_v43 = vsel %vm2222_vm3, 1.0, %v2865_v22  ;;  %vm2873_vm3 = vnez %v2769_v41 }
 0x217   :  { %892 = vadd.xlane.f32.xlu1 %v2869_v59 }
 0x21a   :  { %998 = vadd.xlane.f32.xlu0 %v1318_v11 }
 0x21b   :  { %896 = vadd.xlane.f32.xlu1 %v866_v60 }
 0x21e   :  { %1002 = vadd.xlane.f32.xlu0 %v1320_v42 }
 0x21f   :  { %984 = vadd.xlane.f32.xlu1 %v1311_v50 }
 0x222   :  { %1006 = vadd.xlane.f32.xlu0 %v1322_v51 }
 0x223   :  { %988 = vadd.xlane.f32.xlu1 %v1313_v43 }
 0x227   :  { %992 = vadd.xlane.f32.xlu1 %v1315_v54 }
 0x22b   :  { %996 = vadd.xlane.f32.xlu1 %v1317_v30 }
 0x22f   :  { %1000 = vadd.xlane.f32.xlu1 %v1319_v58 }
 0x233   :  { %1004 = vadd.xlane.f32.xlu1 %v1321_v19 }
 0x23a   :  { %v526_v56 = vpop.permute.xlu0 %525  ;;  %v486_v32 = vpop.permute.xlu1 %485 }
 0x23b   :  { %v567_v16 = vsub.f32 %v1973_v25, %v526_v56  ;;  %v559_v57 = vsub.f32 %v1971_v24, %v486_v32 }
 0x23d   :  { %v592_v39 = vmul.f32 1.442695, %v567_v16  ;;  %v576_v35 = vmul.f32 1.442695, %v559_v57 }
 0x23f   :  { %1469 = vpow2.f32 %v592_v39 }
 0x240   :  { %1471 = vpow2.f32 %v576_v35 }
 0x246   :  { %v481_v59 = vpop.permute.xlu0 %480 }
 0x247   :  { %v558_v8 = vsub.f32 %v1977_v27, %v481_v59 }
 0x249   :  { %v1470_v11 = vpop.eup %1469  ;;  %v574_v60 = vmul.f32 1.442695, %v558_v8 }
 0x24a   :  { %v1472_v42 = vpop.eup %1471  ;;  %v521_v50 = vpop.permute.xlu1 %520  ;;  %v615_v51 = vsel %vm2873_vm3, %v1470_v11, 0.0  ;;  %vm2885_vm3 = vnez %v2808_v46  ;;  %v1323_v46 = vsel %vm2519_vm1, 1.0, %v2865_v22  ;;  %v939_v22 = vld [vmem:[#allocation5 + $0x38] sm:$0xff] }
 0x24b   :  { %v536_v55 = vpop.permute.xlu0 %535  ;;  %1473 = vpow2.f32 %v574_v60  ;;  %v566_v25 = vsub.f32 %v1979_v28, %v521_v50  ;;  %672 = vadd.xlane.f32.xlu1 %v615_v51  ;;  %v607_v24 = vsel %vm2874_vm12, %v1472_v42, 0.0  ;;  %vm2886_vm12 = vnez %v2806_v40 }
 0x24c   :  { %656 = vadd.xlane.f32.xlu0 %v607_v24  ;;  %v569_v54 = vsub.f32 %v1999_v34, %v536_v55 }
 0x24d   :  { %v590_v43 = vmul.f32 1.442695, %v566_v25 }
 0x24e   :  { %v496_v27 = vpop.permute.xlu1 %495  ;;  %v596_v58 = vmul.f32 1.442695, %v569_v54 }
 0x24f   :  { %1475 = vpow2.f32 %v590_v43  ;;  %v561_v30 = vsub.f32 %v1997_v33, %v496_v27 }
 0x251   :  { %v580_v19 = vmul.f32 1.442695, %v561_v30 }
 0x252   :  { %v491_v56 = vpop.permute.xlu1 %490 }
 0x253   :  { %1477 = vpow2.f32 %v580_v19  ;;  %v560_v41 = vsub.f32 %v2010_v37, %v491_v56 }
 0x254   :  { %1479 = vpow2.f32 %v596_v58 }
 0x255   :  { %v1474_v32 = vpop.eup %1473  ;;  %v578_v28 = vmul.f32 1.442695, %v560_v41 }
 0x256   :  { %v606_v63 = vsel %vm2875_vm5, %v1474_v32, 0.0 }
 0x257   :  { %1481 = vpow2.f32 %v578_v28  ;;  %654 = vadd.xlane.f32.xlu1 %v606_v63 }
 0x259   :  { %v1476_v16 = vpop.eup %1475 }
 0x25a   :  { %v531_v34 = vpop.permute.xlu1 %530  ;;  %v546_v57 = vpop.permute.xlu0 %545  ;;  %v614_v33 = vsel %vm2876_vm11, %v1476_v16, 0.0 }
 0x25b   :  { %v568_v39 = vsub.f32 %v2012_v38, %v531_v34  ;;  %v571_v35 = vsub.f32 %v2047_v49, %v546_v57  ;;  %670 = vadd.xlane.f32.xlu0 %v614_v33 }
 0x25d   :  { %v1478_v37 = vpop.eup %1477  ;;  %v594_v59 = vmul.f32 1.442695, %v568_v39  ;;  %v600_v8 = vmul.f32 1.442695, %v571_v35 }
 0x25e   :  { %v506_v11 = vpop.permute.xlu1 %505  ;;  %v609_v5 = vsel %vm2877_vm8, %v1478_v37, 0.0  ;;  %v1480_v60 = vpop.eup %1479  ;;  %v849_v37 = vld [vmem:[#allocation4 + $0x68] sm:$0xff] }
 0x25f   :  { %1483 = vpow2.f32 %v594_v59  ;;  %v563_v42 = vsub.f32 %v2045_v48, %v506_v11  ;;  %660 = vadd.xlane.f32.xlu1 %v609_v5  ;;  %v617_v49 = vsel %vm2879_vm7, %v1480_v60, 0.0  ;;  %v935_v5 = vld [vmem:[#allocation5 + $0x18] sm:$0xff] }
 0x260   :  { %1485 = vpow2.f32 %v600_v8  ;;  %v851_v8 = vld [vmem:[#allocation4 + $0x78] sm:$0xff] }
 0x261   :  { %v1482_v50 = vpop.eup %1481  ;;  %v584_v31 = vmul.f32 1.442695, %v563_v42  ;;  %v937_v42 = vld [vmem:[#allocation5 + $0x28] sm:$0xff] }
 0x262   :  { %v501_v55 = vpop.permute.xlu1 %500  ;;  %v608_v38 = vsel %vm2878_vm13, %v1482_v50, 0.0 }
 0x263   :  { %1487 = vpow2.f32 %v584_v31  ;;  %v562_v51 = vsub.f32 %v2058_v52, %v501_v55  ;;  %658 = vadd.xlane.f32.xlu0 %v608_v38  ;;  %676 = vadd.xlane.f32.xlu1 %v617_v49  ;;  %v848_v31 = vld [vmem:[#allocation4 + $0x60] sm:$0xff] }
 0x265   :  { %v582_v4 = vmul.f32 1.442695, %v562_v51 }
 0x266   :  { %v541_v25 = vpop.permute.xlu1 %540  ;;  %v556_v24 = vpop.permute.xlu0 %555 }
 0x267   :  { %1489 = vpow2.f32 %v582_v4  ;;  %v570_v48 = vsub.f32 %v2060_v53, %v541_v25  ;;  %v573_v43 = vsub.f32 %v2096_v14, %v556_v24  ;;  %v941_v4 = vld [vmem:[#allocation5 + $0x48] sm:$0xff]  ;;  %v850_v25 = vld [vmem:[#allocation4 + $0x70] sm:$0xff] }
 0x269   :  { %v1484_v54 = vpop.eup %1483  ;;  %v598_v27 = vmul.f32 1.442695, %v570_v48  ;;  %v604_v26 = vmul.f32 1.442695, %v573_v43 }
 0x26a   :  { %v516_v30 = vpop.permute.xlu1 %515  ;;  %v616_v45 = vsel %vm2880_vm4, %v1484_v54, 0.0  ;;  %v1486_v58 = vpop.eup %1485 }
 0x26b   :  { %1491 = vpow2.f32 %v598_v27  ;;  %v565_v52 = vsub.f32 %v2094_v9, %v516_v30  ;;  %674 = vadd.xlane.f32.xlu0 %v616_v45  ;;  %v619_v14 = vsel %vm2882_vm14, %v1486_v58, 0.0  ;;  %v943_v27 = vld [vmem:[#allocation5 + $0x58] sm:$0xff] }
 0x26c   :  { %1493 = vpow2.f32 %v604_v26  ;;  %v934_v26 = vld [vmem:[#allocation5 + $0x10] sm:$0xff] }
 0x26d   :  { %v1488_v19 = vpop.eup %1487  ;;  %v588_v56 = vmul.f32 1.442695, %v565_v52 }
 0x26e   :  { %v511_v41 = vpop.permute.xlu1 %510  ;;  %v611_v53 = vsel %vm2881_vm9, %v1488_v19, 0.0  ;;  %v945_v19 = vld [vmem:[#allocation5 + $0x68] sm:$0xff] }
 0x26f   :  { %1495 = vpow2.f32 %v588_v56  ;;  %v564_v32 = vsub.f32 %v2099_v17, %v511_v41  ;;  %664 = vadd.xlane.f32.xlu1 %v611_v53  ;;  %680 = vadd.xlane.f32.xlu0 %v619_v14  ;;  %v936_v56 = vld [vmem:[#allocation5 + $0x20] sm:$0xff] }
 0x271   :  { %v1490_v7 = vpop.eup %1489  ;;  %v586_v28 = vmul.f32 1.442695, %v564_v32 }
 0x272   :  { %v551_v63 = vpop.permute.xlu1 %550  ;;  %v610_v9 = vsel %vm2883_vm0, %v1490_v7, 0.0  ;;  %v938_v7 = vld [vmem:[#allocation5 + $0x30] sm:$0xff] }
 0x273   :  { %1497 = vpow2.f32 %v586_v28  ;;  %v572_v16 = vsub.f32 %v2101_v18, %v551_v63  ;;  %662 = vadd.xlane.f32.xlu0 %v610_v9  ;;  %v940_v9 = vld [vmem:[#allocation5 + $0x40] sm:$0xff] }
 0x275   :  { %v1492_v15 = vpop.eup %1491  ;;  %v602_v34 = vmul.f32 1.442695, %v572_v16 }
 0x276   :  { %v1494_v57 = vpop.eup %1493  ;;  %v618_v47 = vsel %vm2884_vm6, %v1492_v15, 0.0 }
 0x277   :  { %1499 = vpow2.f32 %v602_v34  ;;  %678 = vadd.xlane.f32.xlu1 %v618_v47  ;;  %v621_v17 = vsel %vm2474_vm10, %v1494_v57, 0.0  ;;  %vm2887_vm10 = vcmask 7168   ;;  %v942_v34 = vld [vmem:[#allocation5 + $0x50] sm:$0xff] }
 0x278   :  { %684 = vadd.xlane.f32.xlu0 %v621_v17  ;;  %v944_v17 = vld [vmem:[#allocation5 + $0x60] sm:$0xff] }
 0x279   :  { %v1496_v33 = vpop.eup %1495 }
 0x27a   :  { %v613_v1 = vsel %vm2885_vm3, %v1496_v33, 0.0 }
 0x27b   :  { %668 = vadd.xlane.f32.xlu1 %v613_v1 }
 0x27d   :  { %v1498_v39 = vpop.eup %1497 }
 0x27e   :  { %v612_v18 = vsel %vm2886_vm12, %v1498_v39, 0.0  ;;  %v2903_v39 = vld [vmem:[#allocation11_spill] sm:$0xff] }
 0x27f   :  { %666 = vadd.xlane.f32.xlu0 %v612_v18  ;;  %v2904_v18 = vsub.f32 %v2296_v2, %v2903_v39  ;;  %v2927_v39 = vld [vmem:[#allocation21_spill] sm:$0xff] }
 0x281   :  { %v1500_v35 = vpop.eup %1499 }
 0x282   :  { %v620_v44 = vsel %vm2506_vm2, %v1500_v35, 0.0  ;;  %vm2888_vm2 = vmmov %vm2887_vm10  ;;  %v464_v35 = vmul.f32 1.442695, %v2904_v18  ;;  %v2928_v18 = vld [vmem:[#allocation22_spill] sm:$0xff] }
 0x283   :  { %682 = vadd.xlane.f32.xlu1 %v620_v44  ;;  %1010 = vadd.xlane.f32.xlu0 %v1324_v20  ;;  %vm2889_vm15 = vmmov %vm2888_vm2  ;;  %v2905_v44 = vld [vmem:[#allocation10_spill] sm:$0xff]  ;;  %v2906_v20 = vld [vmem:[#allocation12_spill] sm:$0xff] }
 0x284   :  { %vm2890_vm1 = vmmov %vm2888_vm2  ;;  %1501 = vpow2.f32 %v464_v35  ;;  %v2929_v35 = vsub.f32 %v2927_v39, %v2928_v18  ;;  %v2948_v18 = vsub.f32 %v2445_v10, %v2451_v61 }
 0x285   :  { %vm2891_vm5 = vmmov %vm2890_vm1 }
 0x286   :  { %vm2892_vm11 = vmmov %vm2890_vm1 }
 0x287   :  { %1008 = vadd.xlane.f32.xlu1 %v1323_v46  ;;  %vm2893_vm8 = vmmov %vm2890_vm1  ;;  %v2907_v46 = vsub.f32 %v2905_v44, %v2906_v20  ;;  %v456_v44 = vmul.f32 1.442695, %v2929_v35  ;;  %v458_v35 = vmul.f32 1.442695, %v2948_v18 }
 0x288   :  { %vm2894_vm13 = vmmov %vm2890_vm1 }
 0x289   :  { %vm2895_vm7 = vmmov %vm2890_vm1 }
 0x28a   :  { %vm2896_vm4 = vmmov %vm2890_vm1 }
 0x28b   :  { %vm2897_vm9 = vmmov %vm2890_vm1 }
 0x28c   :  { %vm2898_vm14 = vmmov %vm2890_vm1 }
 0x28d   :  { %vm2899_vm0 = vmmov %vm2890_vm1 }
 0x28e   :  { %vm2900_vm6 = vmmov %vm2899_vm0 }
 0x28f   :  { %vm2901_vm3 = vmmov %vm2899_vm0 }
 0x290   :  { %vm2902_vm12 = vmmov %vm2899_vm0 }
 0x293   :  { %v895_v59 = vpop.xlane.xlu0 %894 }
 0x294   :  { %v913_v40 = vadd.f32 %v895_v59, %v849_v37  ;;  %v448_v37 = vmul.f32 1.442695, %v2907_v46  ;;  %v2908_v59 = vld [vmem:[#allocation14_spill] sm:$0xff] }
 0x296   :  { %929 = vst.msk [vmem:[#allocation4 + $0x68] sm:$0xff] %vm2887_vm10, %v913_v40  ;;  %1503 = vpow2.f32 %v448_v37  ;;  %v2909_v40 = vld [vmem:[#allocation16_spill] sm:$0xff]  ;;  %vm2916_vm10 = vmmov %vm2899_vm0 }
 0x297   :  { %v899_v11 = vpop.xlane.xlu0 %898  ;;  %v2930_v37 = vld [vmem:[#allocation24_spill] sm:$0xff] }
 0x298   :  { %v915_v21 = vadd.f32 %v899_v11, %v851_v8  ;;  %v2910_v8 = vsub.f32 %v2908_v59, %v2909_v40  ;;  %v2931_v59 = vld [vmem:[#allocation26_spill] sm:$0xff] }
 0x299   :  { %v2932_v40 = vsub.f32 %v2930_v37, %v2931_v59 }
 0x29a   :  { %931 = vst.msk [vmem:[#allocation4 + $0x78] sm:$0xff] %vm2888_vm2, %v915_v21  ;;  %v446_v11 = vmul.f32 1.442695, %v2910_v8  ;;  %v1502_v21 = vpop.eup %1501  ;;  %vm2917_vm2 = vmmov %vm2899_vm0 }
 0x29b   :  { %v987_v13 = vpop.xlane.xlu0 %986  ;;  %v472_v8 = vmul.f32 1.442695, %v2932_v40 }
 0x29c   :  { %v1015_v60 = vadd.f32 %v987_v13, %v935_v5  ;;  %v631_v5 = vld [vmem:[#allocation3 + $0x48] sm:$0xff]  ;;  %1505 = vpow2.f32 %v446_v11 }
 0x29e   :  { %1031 = vst.msk [vmem:[#allocation5 + $0x18] sm:$0xff] %vm2889_vm15, %v1015_v60  ;;  %v623_v60 = vld [vmem:[#allocation3 + $0x8] sm:$0xff]  ;;  %vm2926_vm15 = vmmov %vm2899_vm0 }
 0x29f   :  { %v991_v50 = vpop.xlane.xlu0 %990 }
 0x2a0   :  { %v1017_v62 = vadd.f32 %v991_v50, %v937_v42  ;;  %v1504_v13 = vpop.eup %1503  ;;  %v2911_v42 = vld [vmem:[#allocation18_spill] sm:$0xff]  ;;  %v2912_v50 = vld [vmem:[#allocation20_spill] sm:$0xff] }
 0x2a2   :  { %1033 = vst.msk [vmem:[#allocation5 + $0x28] sm:$0xff] %vm2890_vm1, %v1017_v62  ;;  %v2913_v62 = vsub.f32 %v2911_v42, %v2912_v50  ;;  %vm2933_vm1 = vmmov %vm2899_vm0  ;;  %v624_v42 = vld [vmem:[#allocation3 + $0x10] sm:$0xff]  ;;  %v2934_v50 = vld [vmem:[#allocation9_spill] sm:$0xff] }
 0x2a3   :  { %v995_v55 = vpop.xlane.xlu0 %994 }
 0x2a4   :  { %v1019_v38 = vadd.f32 %v995_v55, %v939_v22  ;;  %v893_v49 = vpop.xlane.xlu1 %892  ;;  %v462_v2 = vmul.f32 1.442695, %v2913_v62  ;;  %v647_v22 = vmul.f32 %v1502_v21, %v631_v5  ;;  %v1128_v62 = vld [vmem:[#allocation2 + $0x8] sm:$0xff] }
 0x2a5   :  { %v912_v51 = vadd.f32 %v893_v49, %v848_v31  ;;  %v2632_v31 = vld [vmem:[#allocation5 + $0x8] sm:$0xff] }
 0x2a6   :  { %1035 = vst.msk [vmem:[#allocation5 + $0x38] sm:$0xff] %vm2891_vm5, %v1019_v38  ;;  %v639_v38 = vmul.f32 %v1504_v13, %v623_v60  ;;  %1507 = vpow2.f32 %v462_v2  ;;  %v633_v60 = vld [vmem:[#allocation3 + $0x58] sm:$0xff]  ;;  %vm1224_vm5 = vcmp.lt.s32.totalorder %v2934_v50, 12 }
 0x2a7   :  { %928 = vst.msk [vmem:[#allocation4 + $0x60] sm:$0xff] %vm2892_vm11, %v912_v51  ;;  %v999_v24 = vpop.xlane.xlu0 %998  ;;  %vm1240_vm11 = vcmp.gt.f32.partialorder %v2632_v31, 0.0 }
 0x2a8   :  { %v1021_v48 = vadd.f32 %v999_v24, %v941_v4  ;;  %v897_v43 = vpop.xlane.xlu1 %896  ;;  %v2914_v4 = vld [vmem:[#allocation13_spill] sm:$0xff] }
 0x2a9   :  { %v914_v54 = vadd.f32 %v897_v43, %v850_v25  ;;  %v2915_v25 = vsub.f32 %v2914_v4, %v2321_v3  ;;  %v1080_v43 = vmax.f32 %v2632_v31, 1.0  ;;  %v1506_v3 = vpop.eup %1505  ;;  %v632_v31 = vld [vmem:[#allocation3 + $0x50] sm:$0xff] }
 0x2aa   :  { %1037 = vst.msk [vmem:[#allocation5 + $0x48] sm:$0xff] %vm2893_vm8, %v1021_v48  ;;  %vm2938_vm8 = vmmov %vm2899_vm0 }
 0x2ab   :  { %930 = vst.msk [vmem:[#allocation4 + $0x70] sm:$0xff] %vm2894_vm13, %v914_v54  ;;  %v1003_v30 = vpop.xlane.xlu0 %1002  ;;  %v452_v24 = vmul.f32 1.442695, %v2915_v25  ;;  %v2918_v54 = vld [vmem:[#allocation15_spill] sm:$0xff]  ;;  %vm1256_vm13 = vmand %vm1224_vm5, %vm1240_vm11 }
 0x2ac   :  { %v1023_v45 = vadd.f32 %v1003_v30, %v943_v27  ;;  %v985_v58 = vpop.xlane.xlu1 %984  ;;  %v2919_v27 = vld [vmem:[#allocation17_spill] sm:$0xff]  ;;  %vm2957_vm5 = vmmov %vm2933_vm1 }
 0x2ad   :  { %v1014_v52 = vadd.f32 %v985_v58, %v934_v26  ;;  %v2920_v26 = vsub.f32 %v2918_v54, %v2919_v27  ;;  %1509 = vpow2.f32 %v452_v24  ;;  %vm2958_vm11 = vmmov %vm2933_vm1 }
 0x2ae   :  { %1039 = vst.msk [vmem:[#allocation5 + $0x58] sm:$0xff] %vm2895_vm7, %v1023_v45  ;;  %v2921_v45 = vld [vmem:[#allocation19_spill] sm:$0xff]  ;;  %1511 = vrcp.f32 %v1080_v43  ;;  %vm2943_vm7 = vmmov %vm2899_vm0 }
 0x2af   :  { %1030 = vst.msk [vmem:[#allocation5 + $0x10] sm:$0xff] %vm2896_vm4, %v1014_v52  ;;  %v1007_v41 = vpop.xlane.xlu0 %1006  ;;  %v468_v30 = vmul.f32 1.442695, %v2920_v26  ;;  %v2922_v58 = vsub.f32 %v2921_v45, %v2355_v36  ;;  %vm2944_vm4 = vmmov %vm2899_vm0 }
 0x2b0   :  { %v1025_v53 = vadd.f32 %v1007_v41, %v945_v19  ;;  %v989_v14 = vpop.xlane.xlu1 %988  ;;  %v622_v19 = vld [vmem:[#allocation3] sm:$0xff] }
 0x2b1   :  { %v1016_v32 = vadd.f32 %v989_v14, %v936_v56  ;;  %v450_v52 = vmul.f32 1.442695, %v2922_v58  ;;  %1513 = vpow2.f32 %v468_v30  ;;  %v638_v41 = vmul.f32 %v1506_v3, %v622_v19  ;;  %v2646_v14 = vld [vmem:[#allocation5] sm:$0xff]  ;;  %v2940_v19 = vld [vmem:[#allocation30_spill] sm:$0xff] }
 0x2b2   :  { %1041 = vst.msk [vmem:[#allocation5 + $0x68] sm:$0xff] %vm2897_vm9, %v1025_v53  ;;  %v1508_v53 = vpop.eup %1507  ;;  %v1079_v36 = vmax.f32 %v2646_v14, 1.0  ;;  %v2939_v58 = vsub.f32 %v2416_v0, %v2430_v23  ;;  %v1063_v3 = vld [vmem:[#allocation4] sm:$0xff]  ;;  %vm2945_vm9 = vmmov %vm2899_vm0  ;;  %v2946_v23 = vld [vmem:[#allocation28_spill] sm:$0xff] }
 0x2b3   :  { %1032 = vst.msk [vmem:[#allocation5 + $0x20] sm:$0xff] %vm2898_vm14, %v1016_v32  ;;  %1515 = vpow2.f32 %v450_v52  ;;  %vm2949_vm14 = vmmov %vm2899_vm0 }
 0x2b4   :  { %v993_v28 = vpop.xlane.xlu1 %992  ;;  %v470_v52 = vmul.f32 1.442695, %v2939_v58 }
 0x2b5   :  { %v1018_v63 = vadd.f32 %v993_v28, %v938_v7  ;;  %v630_v7 = vld [vmem:[#allocation3 + $0x40] sm:$0xff] }
 0x2b7   :  { %1034 = vst.msk [vmem:[#allocation5 + $0x30] sm:$0xff] %vm2899_vm0, %v1018_v63  ;;  %v2923_v63 = vld [vmem:[#allocation23_spill] sm:$0xff]  ;;  %vm1239_vm0 = vcmp.gt.f32.partialorder %v2646_v14, 0.0 }
 0x2b8   :  { %v997_v16 = vpop.xlane.xlu1 %996 }
 0x2b9   :  { %v1020_v15 = vadd.f32 %v997_v16, %v940_v9  ;;  %v2924_v9 = vld [vmem:[#allocation25_spill] sm:$0xff] }
 0x2ba   :  { %v2925_v16 = vsub.f32 %v2923_v63, %v2924_v9  ;;  %v2947_v63 = vsub.f32 %v2946_v23, %v2414_v29 }
 0x2bb   :  { %1036 = vst.msk [vmem:[#allocation5 + $0x40] sm:$0xff] %vm2900_vm6, %v1020_v15  ;;  %vm2951_vm6 = vmmov %vm2933_vm1 }
 0x2bc   :  { %v1001_v57 = vpop.xlane.xlu1 %1000  ;;  %v466_v15 = vmul.f32 1.442695, %v2925_v16  ;;  %v460_v9 = vmul.f32 1.442695, %v2947_v63 }
 0x2bd   :  { %v1022_v47 = vadd.f32 %v1001_v57, %v942_v34  ;;  %v1064_v34 = vld [vmem:[#allocation4 + $0x8] sm:$0xff]  ;;  %v646_v57 = vmul.f32 %v1508_v53, %v630_v7 }
 0x2bf   :  { %1038 = vst.msk [vmem:[#allocation5 + $0x50] sm:$0xff] %vm2901_vm3, %v1022_v47  ;;  %v1510_v47 = vpop.eup %1509  ;;  %vm2952_vm3 = vmmov %vm2933_vm1 }
 0x2c0   :  { %v1005_v33 = vpop.xlane.xlu1 %1004 }
 0x2c1   :  { %v1024_v1 = vadd.f32 %v1005_v33, %v944_v17  ;;  %v625_v33 = vld [vmem:[#allocation3 + $0x18] sm:$0xff] }
 0x2c2   :  { %v641_v21 = vmul.f32 %v1510_v47, %v625_v33  ;;  %v635_v47 = vld [vmem:[#allocation3 + $0x68] sm:$0xff]  ;;  %v1127_v33 = vld [vmem:[#allocation2] sm:$0xff] }
 0x2c3   :  { %1040 = vst.msk [vmem:[#allocation5 + $0x60] sm:$0xff] %vm2902_vm12, %v1024_v1  ;;  %v1512_v1 = vpop.eup %1511  ;;  %vm2953_vm12 = vmmov %vm2933_vm1 }
 0x2c4   :  { %v1098_v46 = vmul.f32 %v1512_v1, %v1064_v34  ;;  %v1514_v11 = vpop.eup %1513 }
 0x2c5   :  { %v1516_v5 = vpop.eup %1515 }
 0x2c6   :  { %v640_v43 = vmul.f32 %v1516_v5, %v624_v42  ;;  %v2950_v5 = vsub.f32 %v2453_v12, %v2461_v6  ;;  %v634_v42 = vld [vmem:[#allocation3 + $0x60] sm:$0xff] }
 0x2c8   :  { %v474_v61 = vmul.f32 1.442695, %v2950_v5 }
 0x2d8   :  { %v673_v55 = vpop.xlane.xlu1 %672 }
 0x2d9   :  { %v695_v49 = vadd.f32 %v673_v55, %v647_v22  ;;  %v657_v51 = vpop.xlane.xlu0 %656  ;;  %v1144_v55 = vsub.f32 %v1098_v46, %v1128_v62 }
 0x2da   :  { %v687_v48 = vadd.f32 %v657_v51, %v639_v38  ;;  %v2935_v38 = vld [vmem:[#allocation27_spill] sm:$0xff] }
 0x2db   :  { %712 = vst.msk [vmem:[#allocation3 + $0x48] sm:$0xff] %vm2916_vm10, %v695_v49  ;;  %v2936_v49 = vld [vmem:[#allocation29_spill] sm:$0xff]  ;;  %vm2954_vm10 = vmmov %vm2933_vm1 }
 0x2dc   :  { %704 = vst.msk [vmem:[#allocation3 + $0x8] sm:$0xff] %vm2917_vm2, %v687_v48  ;;  %v2937_v51 = vsub.f32 %v2935_v38, %v2936_v49  ;;  %v649_v48 = vmul.f32 %v1514_v11, %v633_v60  ;;  %v629_v38 = vld [vmem:[#allocation3 + $0x38] sm:$0xff]  ;;  %vm2955_vm2 = vmmov %vm2933_vm1 }
 0x2de   :  { %v454_v4 = vmul.f32 1.442695, %v2937_v51 }
 0x2e3   :  { %v1160_v56 = vld [vmem:[#allocation3 + $0x8] sm:$0xff] }
 0x2e4   :  { %1517 = vlog2.f32 %v1160_v56  ;;  %v655_v32 = vpop.xlane.xlu1 %654  ;;  %v2941_v56 = vld [vmem:[#allocation31_spill] sm:$0xff] }
 0x2e5   :  { %v686_v28 = vadd.f32 %v655_v32, %v638_v41  ;;  %1519 = vpow2.f32 %v466_v15  ;;  %v2942_v41 = vsub.f32 %v2940_v19, %v2941_v56 }
 0x2e6   :  { %1521 = vrcp.f32 %v1079_v36 }
 0x2e7   :  { %703 = vst.msk [vmem:[#allocation3] sm:$0xff] %vm2926_vm15, %v686_v28  ;;  %1523 = vpow2.f32 %v456_v44  ;;  %v476_v53 = vmul.f32 1.442695, %v2942_v41  ;;  %vm2956_vm15 = vmmov %vm2933_vm1 }
 0x2e8   :  { %v671_v17 = vpop.xlane.xlu0 %670  ;;  %1525 = vpow2.f32 %v472_v8  ;;  %v626_v8 = vld [vmem:[#allocation3 + $0x20] sm:$0xff] }
 0x2e9   :  { %v694_v20 = vadd.f32 %v671_v17, %v646_v57  ;;  %v627_v57 = vld [vmem:[#allocation3 + $0x28] sm:$0xff] }
 0x2eb   :  { %711 = vst.msk [vmem:[#allocation3 + $0x40] sm:$0xff] %vm2933_vm1, %v694_v20 }
 0x2ec   :  { %v661_v13 = vpop.xlane.xlu1 %660 }
 0x2ed   :  { %v689_v2 = vadd.f32 %v661_v13, %v641_v21 }
 0x2ee   :  { %v1518_v22 = vpop.eup %1517  ;;  %v1159_v25 = vld [vmem:[#allocation3] sm:$0xff] }
 0x2ef   :  { %v1178_v24 = vmul.f32 0.6931472, %v1518_v22  ;;  %1527 = vlog2.f32 %v1159_v25  ;;  %706 = vst.msk [vmem:[#allocation3 + $0x18] sm:$0xff] %vm2938_vm8, %v689_v2  ;;  %v1520_v7 = vpop.eup %1519  ;;  %v637_v2 = vld [vmem:[#allocation3 + $0x78] sm:$0xff]  ;;  %vm2959_vm8 = vmmov %vm2933_vm1 }
 0x2f0   :  { %v677_v54 = vpop.xlane.xlu1 %676  ;;  %v659_v27 = vpop.xlane.xlu0 %658  ;;  %1529 = vpow2.f32 %v454_v4  ;;  %v648_v15 = vmul.f32 %v1520_v7, %v632_v31 }
 0x2f1   :  { %v1208_v26 = vsub.f32 %v1144_v55, %v1178_v24  ;;  %v697_v30 = vadd.f32 %v677_v54, %v649_v48  ;;  %v688_v45 = vadd.f32 %v659_v27, %v640_v43  ;;  %v1522_v28 = vpop.eup %1521  ;;  %1531 = vpow2.f32 %v470_v52  ;;  %v628_v43 = vld [vmem:[#allocation3 + $0x30] sm:$0xff]  ;;  %v947_v52 = vld [vmem:[#allocation5 + $0x78] sm:$0xff] }
 0x2f2   :  { %v1096_v0 = vmul.f32 %v1522_v28, %v1063_v3  ;;  %v1524_v16 = vpop.eup %1523  ;;  %1533 = vpow2.f32 %v476_v53 }
 0x2f3   :  { %v1272_v32 = vsel %vm1256_vm13, %v1208_v26, 0.0  ;;  %714 = vst.msk [vmem:[#allocation3 + $0x58] sm:$0xff] %vm2943_vm7, %v697_v30  ;;  %v1526_v36 = vpop.eup %1525  ;;  %1535 = vpow2.f32 %v460_v9  ;;  %v643_v29 = vmul.f32 %v1524_v16, %v627_v57  ;;  %vm2960_vm13 = vmmov %vm2933_vm1 }
 0x2f4   :  { %705 = vst.msk [vmem:[#allocation3 + $0x10] sm:$0xff] %vm2944_vm4, %v688_v45  ;;  %v1143_v39 = vsub.f32 %v1096_v0, %v1127_v33  ;;  %v651_v20 = vmul.f32 %v1526_v36, %v635_v47  ;;  %1537 = vpow2.f32 %v458_v35  ;;  %v636_v45 = vld [vmem:[#allocation3 + $0x70] sm:$0xff] }
 0x2f5   :  { %1288 = vst.msk [vmem:[%s2711_s4 + $0x8] sm:$0xff] %vm2945_vm9, %v1272_v32  ;;  %1539 = vpow2.f32 %v474_v61  ;;  %v946_v32 = vld [vmem:[#allocation5 + $0x70] sm:$0xff] }
 0x2f8   :  { %v675_v34 = vpop.xlane.xlu0 %674 }
 0x2f9   :  { %v1528_v17 = vpop.eup %1527  ;;  %v696_v1 = vadd.f32 %v675_v34, %v648_v15 }
 0x2fa   :  { %v1176_v44 = vmul.f32 0.6931472, %v1528_v17  ;;  %v1530_v46 = vpop.eup %1529 }
 0x2fb   :  { %713 = vst.msk [vmem:[#allocation3 + $0x50] sm:$0xff] %vm2949_vm14, %v696_v1  ;;  %v642_v13 = vmul.f32 %v1530_v46, %v626_v8  ;;  %v1532_v60 = vpop.eup %1531 }
 0x2fc   :  { %v1207_v37 = vsub.f32 %v1143_v39, %v1176_v44  ;;  %v665_v59 = vpop.xlane.xlu1 %664  ;;  %v681_v40 = vpop.xlane.xlu0 %680  ;;  %v650_v12 = vmul.f32 %v1532_v60, %v634_v42 }
 0x2fd   :  { %v691_v11 = vadd.f32 %v665_v59, %v643_v29  ;;  %v699_v21 = vadd.f32 %v681_v40, %v651_v20  ;;  %v1534_v50 = vpop.eup %1533 }
 0x2fe   :  { %v1271_v10 = vsel %vm1239_vm0, %v1207_v37, 0.0  ;;  %v1536_v6 = vpop.eup %1535  ;;  %v653_v55 = vmul.f32 %v1534_v50, %v637_v2 }
 0x2ff   :  { %1287 = vst.msk [vmem:[%s2711_s4] sm:$0xff] %vm2951_vm6, %v1271_v10  ;;  %v645_v25 = vmul.f32 %v1536_v6, %v629_v38  ;;  %v1538_v24 = vpop.eup %1537 }
 0x300   :  { %708 = vst.msk [vmem:[#allocation3 + $0x28] sm:$0xff] %vm2952_vm3, %v691_v11  ;;  %v663_v14 = vpop.xlane.xlu0 %662  ;;  %v644_v27 = vmul.f32 %v1538_v24, %v628_v43  ;;  %v1540_v26 = vpop.eup %1539 }
 0x301   :  { %716 = vst.msk [vmem:[#allocation3 + $0x68] sm:$0xff] %vm2953_vm12, %v699_v21  ;;  %v690_v62 = vadd.f32 %v663_v14, %v642_v13  ;;  %v652_v3 = vmul.f32 %v1540_v26, %v636_v45 }
 0x303   :  { %707 = vst.msk [vmem:[#allocation3 + $0x20] sm:$0xff] %vm2954_vm10, %v690_v62 }
 0x304   :  { %v679_v22 = vpop.xlane.xlu1 %678 }
 0x305   :  { %v698_v49 = vadd.f32 %v679_v22, %v650_v12  ;;  %v685_v51 = vpop.xlane.xlu0 %684 }
 0x306   :  { %v701_v4 = vadd.f32 %v685_v51, %v653_v55 }
 0x307   :  { %715 = vst.msk [vmem:[#allocation3 + $0x60] sm:$0xff] %vm2955_vm2, %v698_v49 }
 0x308   :  { %718 = vst.msk [vmem:[#allocation3 + $0x78] sm:$0xff] %vm2956_vm15, %v701_v4  ;;  %v669_v48 = vpop.xlane.xlu1 %668 }
 0x309   :  { %v693_v54 = vadd.f32 %v669_v48, %v645_v25 }
 0x30b   :  { %710 = vst.msk [vmem:[#allocation3 + $0x38] sm:$0xff] %vm2933_vm1, %v693_v54 }
 0x30c   :  { %v667_v30 = vpop.xlane.xlu0 %666 }
 0x30d   :  { %v692_v58 = vadd.f32 %v667_v30, %v644_v27 }
 0x30f   :  { %709 = vst.msk [vmem:[#allocation3 + $0x30] sm:$0xff] %vm2957_vm5, %v692_v58 }
 0x310   :  { %v683_v19 = vpop.xlane.xlu1 %682  ;;  %v1011_v56 = vpop.xlane.xlu0 %1010 }
 0x311   :  { %v700_v41 = vadd.f32 %v683_v19, %v652_v3  ;;  %v1027_v53 = vadd.f32 %v1011_v56, %v947_v52 }
 0x313   :  { %717 = vst.msk [vmem:[#allocation3 + $0x70] sm:$0xff] %vm2958_vm11, %v700_v41 }
 0x314   :  { %1043 = vst.msk [vmem:[#allocation5 + $0x78] sm:$0xff] %vm2959_vm8, %v1027_v53  ;;  %v1009_v7 = vpop.xlane.xlu1 %1008 }
 0x315   :  { %v1026_v31 = vadd.f32 %v1009_v7, %v946_v32 }
 0x317   :  { %1042 = vst.msk [vmem:[#allocation5 + $0x70] sm:$0xff] %vm2960_vm13, %v1026_v31 }
 0x318   :  { %1307 = vsyncpa [#allocation7], 1 }

</bundles_post_ra>
